<compile_context>
chip_gen: v7x
topology: tpu7x:2x2x1
jax: 0.10.0
libtpu: 0.0.40
codegen_flags: <defaults>
</compile_context>

<pallas_src>
import functools

import jax
import jax.numpy as jnp
from jax.experimental import pallas as pl
from jax.experimental.pallas import tpu as pltpu

LN_EPS = 1e-5
_LANE = 128
_SUBLANE = 8


def _round_up(x, m):
    return (x + m - 1) // m * m


def _ffres_kernel(x_ref, attr_ref, gamma_ref, beta_ref,
                  w1_ref, b1_ref, w2_ref, ws_ref, b2s_ref,
                  out_ref, *, inv_cin):
    x = x_ref[...]                      # (TN, Cin) f32, native channel width
    a = attr_ref[...]                   # (TN, 1)   f32 (the 1x0e node attr)

    # ---- EquivariantLayerNormV2 (scalar irreps == LayerNorm over channels) ----
    # Exact two-pass mean/var over the real Cin width (no padded lanes).
    mu = jnp.sum(x, axis=-1, keepdims=True) * inv_cin
    xc = x - mu
    var = jnp.sum(xc * xc, axis=-1, keepdims=True) * inv_cin
    xn = xc * jax.lax.rsqrt(var + LN_EPS) * gamma_ref[...] + beta_ref[...]

    bf16 = jnp.bfloat16

    # ---- fctp_1 + swish gate: SiLU((xn @ W1) * a + b1) ----
    # Per-node scalar attr commutes through the matmul; fold into the narrow LHS.
    h = jnp.dot((xn * a).astype(bf16), w1_ref[...],
                preferred_element_type=jnp.float32) + b1_ref[...]
    h = h * jax.nn.sigmoid(h)           # SiLU / Swish gate (scalar irreps)

    # ---- fctp_2 + ffn_shortcut fused on the output side ----
    #   f + s = a * (h @ W2 + x @ Ws) + (b2 + bs)
    # attr applied once in f32; biases pre-summed on the host.
    fs = jnp.dot(h.astype(bf16), w2_ref[...], preferred_element_type=jnp.float32)
    fs = fs + jnp.dot(x.astype(bf16), ws_ref[...], preferred_element_type=jnp.float32)
    out_ref[...] = a * fs + b2s_ref[...]


def prepare_params(params):
    """One-time host-side prep (do this OUTSIDE the hot path):
    pad the weight output channels to lane multiples, cast weights to bf16,
    and pre-sum the fctp_2 / shortcut biases."""
    cin, cmid = params["w1"].shape
    cout = params["w2"].shape[1]
    cmid_p = _round_up(cmid, _LANE)
    cout_p = _round_up(cout, _LANE)

    def pad2(arr, rows, cols, dtype=jnp.float32):
        arr = jnp.asarray(arr, dtype)
        return jnp.pad(arr, ((0, rows - arr.shape[0]), (0, cols - arr.shape[1])))

    return {
        "cin": cin, "cmid_p": cmid_p, "cout": cout, "cout_p": cout_p,
        "gamma": jnp.asarray(params["gamma"], jnp.float32),      # (1, Cin)
        "beta": jnp.asarray(params["beta"], jnp.float32),        # (1, Cin)
        "w1": pad2(params["w1"], cin, cmid_p, jnp.bfloat16),     # (Cin, Cmid_p)
        "b1": pad2(params["b1"], 1, cmid_p),                     # (1, Cmid_p)
        "w2": pad2(params["w2"], cmid_p, cout_p, jnp.bfloat16),  # (Cmid_p, Cout_p)
        "ws": pad2(params["ws"], cin, cout_p, jnp.bfloat16),     # (Cin, Cout_p)
        "b2s": pad2(params["b2"] + params["bs"], 1, cout_p),     # (1, Cout_p)
    }


def ff_residual_fctp_projection(node_input, node_attr, prep, batch=None, *,
                                tile_n=512):
    """node_input: (N, Cin) f32, node_attr: (N, 1) f32.  `batch` unused (layer norm)."""
    del batch
    N, Cin = node_input.shape
    assert Cin == prep["cin"]
    cmid_p, cout, cout_p = prep["cmid_p"], prep["cout"], prep["cout_p"]

    # --- node (sublane) tiling: ragged grid, no row padding ---
    if N <= tile_n:
        tile_n = N                                  # single tile (block == full dim)
    else:
        g = -(-N // tile_n)
        g += g % 2                                  # even grid -> balances v7x's 2 TCs
        tile_n = _round_up(-(-N // g), _SUBLANE)
    grid_n = -(-N // tile_n)

    x = jnp.asarray(node_input, jnp.float32)
    a = jnp.asarray(node_attr, jnp.float32)

    # --- VMEM budget: 1x resident weights (single-buffered) + double-buffered
    #     streamed activation tiles + headroom; cap leaves slack in v7x's 64 MiB.
    resident = sum(int(prep[k].size) * prep[k].dtype.itemsize
                   for k in ("gamma", "beta", "w1", "b1", "w2", "ws", "b2s"))
    streamed = tile_n * (Cin + 1 + cout_p) * 4
    vmem_limit = int(min(max(resident + 4 * streamed + (4 << 20), 16 << 20), 40 << 20))

    row = lambda i: (i, 0)
    full = lambda i: (0, 0)
    kernel = functools.partial(_ffres_kernel, inv_cin=1.0 / Cin)

    def _run(single_buffer_weights):
        if single_buffer_weights:
            # Constant index_map => DMA'd once; single buffer halves VMEM footprint.
            res = lambda shape: pl.BlockSpec(shape, full, pipeline_mode=pl.Buffered(1))
        else:
            res = lambda shape: pl.BlockSpec(shape, full)
        return pl.pallas_call(
            kernel,
            out_shape=jax.ShapeDtypeStruct((N, cout_p), jnp.float32),
            grid_spec=pltpu.PrefetchScalarGridSpec(
                num_scalar_prefetch=0,
                grid=(grid_n,),
                in_specs=[
                    pl.BlockSpec((tile_n, Cin), row),   # node_input (streamed)
                    pl.BlockSpec((tile_n, 1), row),     # node_attr  (streamed)
                    res((1, Cin)),                      # LN gamma   (resident)
                    res((1, Cin)),                      # LN beta
                    res((Cin, cmid_p)),                 # W1 (bf16)
                    res((1, cmid_p)),                   # b1
                    res((cmid_p, cout_p)),              # W2 (bf16)
                    res((Cin, cout_p)),                 # Ws (shortcut, bf16)
                    res((1, cout_p)),                   # b2 + bs (pre-summed)
                ],
                out_specs=pl.BlockSpec((tile_n, cout_p), row),
            ),
            compiler_params=pltpu.CompilerParams(
                dimension_semantics=("parallel",),
                vmem_limit_bytes=vmem_limit),
        )(x, a, prep["gamma"], prep["beta"], prep["w1"], prep["b1"],
          prep["w2"], prep["ws"], prep["b2s"])

    try:
        out = _run(True)
    except Exception:
        # Fallback for JAX builds without BlockSpec.pipeline_mode / Buffered(1);
        # identical kernel, default double-buffered resident weights.
        out = _run(False)

    return out if cout_p == cout else out[:, :cout]


def _reference(node_input, node_attr, p):
    x = node_input
    a = node_attr
    mu = jnp.mean(x, axis=-1, keepdims=True)
    xc = x - mu
    var = jnp.mean(xc * xc, axis=-1, keepdims=True)
    xn = xc * jax.lax.rsqrt(var + LN_EPS) * p["gamma"] + p["beta"]
    h = xn @ p["w1"] * a + p["b1"]
    h = h * jax.nn.sigmoid(h)
    f = h @ p["w2"] * a + p["b2"]
    s = x @ p["ws"] * a + p["bs"]
    return s + f


def make_params(key, cin, cmid, cout):
    ks = jax.random.split(key, 6)
    scale1 = 1.0 / jnp.sqrt(jnp.float32(cin))    # rescale absorbed into init
    scale2 = 1.0 / jnp.sqrt(jnp.float32(cmid))
    return {
        "gamma": jnp.ones((1, cin), jnp.float32),
        "beta": jnp.zeros((1, cin), jnp.float32),
        "w1": jax.random.normal(ks[0], (cin, cmid), jnp.float32) * scale1,
        "b1": jax.random.normal(ks[1], (1, cmid), jnp.float32) * 0.01,
        "w2": jax.random.normal(ks[2], (cmid, cout), jnp.float32) * scale2,
        "b2": jax.random.normal(ks[3], (1, cout), jnp.float32) * 0.01,
        "ws": jax.random.normal(ks[4], (cin, cout), jnp.float32) * scale1,
        "bs": jax.random.normal(ks[5], (1, cout), jnp.float32) * 0.01,
    }


if __name__ == "__main__":
    key = jax.random.PRNGKey(0)
    k_x, k_a, k_p = jax.random.split(key, 3)

    N, Cin, Cmid, Cout = 64, 32, 64, 32
    node_input = jax.random.normal(k_x, (N, Cin), jnp.float32)
    # irreps_node_attr = '1x0e'; use a non-trivial positive per-node scalar so
    # the attr path is actually exercised (in Equiformer it is typically ones).
    node_attr = 0.5 + jax.random.uniform(k_a, (N, 1), jnp.float32)
    # `batch` (graph-id per node) is unused by the 'layer' norm path.
    batch = jnp.zeros((N,), jnp.int32)

    params = make_params(k_p, Cin, Cmid, Cout)
    prep = prepare_params(params)          # one-time weight pad / bf16 cast

    out = ff_residual_fctp_projection(node_input, node_attr, prep, batch=batch)
    out = jax.block_until_ready(out)

    ref = _reference(node_input, node_attr, params)
    assert out.shape == (N, Cout)
    # bf16 MXU operands => looser tolerance than a pure-f32 reference.
    scale = float(jnp.max(jnp.abs(ref))) + 1e-6
    max_err = float(jnp.max(jnp.abs(out - ref)))
    assert max_err / scale < 2e-2, f"mismatch vs reference: {max_err} (scale {scale})"

    print("KERNEL_OK")
</pallas_src>

<mosaic_0001>
module attributes {stable_mosaic.version = 11 : i64} {
  func.func @_ffres_kernel(%arg0: i32, %arg1: memref<64x32xf32, #tpu.memory_space<vmem>>, %arg2: memref<64x1xf32, #tpu.memory_space<vmem>>, %arg3: memref<1x32xf32, #tpu.memory_space<vmem>>, %arg4: memref<1x32xf32, #tpu.memory_space<vmem>>, %arg5: memref<32x128xbf16, #tpu.memory_space<vmem>>, %arg6: memref<1x128xf32, #tpu.memory_space<vmem>>, %arg7: memref<128x128xbf16, #tpu.memory_space<vmem>>, %arg8: memref<32x128xbf16, #tpu.memory_space<vmem>>, %arg9: memref<1x128xf32, #tpu.memory_space<vmem>>, %arg10: memref<64x128xf32, #tpu.memory_space<vmem>>) attributes {dimension_semantics = [#tpu.dimension_semantics<parallel>], iteration_bounds = array<i64: 1>, scalar_prefetch = 0 : i64, scratch_operands = 0 : i64, tpu.core_type = #tpu.core_type<tc>, window_params = [{transform_indices = @transform_0, window_bounds = array<i64: 64, 32>}, {transform_indices = @transform_1, window_bounds = array<i64: 64, 1>}, {pipeline_mode = #tpu.pipeline_mode<synchronous>, transform_indices = @transform_2, window_bounds = array<i64: 1, 32>}, {pipeline_mode = #tpu.pipeline_mode<synchronous>, transform_indices = @transform_3, window_bounds = array<i64: 1, 32>}, {pipeline_mode = #tpu.pipeline_mode<synchronous>, transform_indices = @transform_4, window_bounds = array<i64: 32, 128>}, {pipeline_mode = #tpu.pipeline_mode<synchronous>, transform_indices = @transform_5, window_bounds = array<i64: 1, 128>}, {pipeline_mode = #tpu.pipeline_mode<synchronous>, transform_indices = @transform_6, window_bounds = array<i64: 128, 128>}, {pipeline_mode = #tpu.pipeline_mode<synchronous>, transform_indices = @transform_7, window_bounds = array<i64: 32, 128>}, {pipeline_mode = #tpu.pipeline_mode<synchronous>, transform_indices = @transform_8, window_bounds = array<i64: 1, 128>}, {transform_indices = @transform_9, window_bounds = array<i64: 64, 128>}]} {
    %c0 = arith.constant 0 : index
    %c0_0 = arith.constant 0 : index
    %0 = vector.load %arg1[%c0, %c0_0] : memref<64x32xf32, #tpu.memory_space<vmem>>, vector<64x32xf32>
    %c0_1 = arith.constant 0 : index
    %c0_2 = arith.constant 0 : index
    %1 = vector.load %arg2[%c0_1, %c0_2] : memref<64x1xf32, #tpu.memory_space<vmem>>, vector<64x1xf32>
    %cst = arith.constant dense<0.000000e+00> : vector<64xf32>
    %2 = vector.multi_reduction <add>, %0, %cst [1] : vector<64x32xf32> to vector<64xf32>
    %3 = vector.shape_cast %2 : vector<64xf32> to vector<64x1xf32>
    %cst_3 = arith.constant 3.125000e-02 : f32
    %4 = vector.broadcast %cst_3 : f32 to vector<64x1xf32>
    %5 = arith.mulf %3, %4 : vector<64x1xf32>
    %6 = vector.broadcast %5 : vector<64x1xf32> to vector<64x32xf32>
    %7 = arith.subf %0, %6 : vector<64x32xf32>
    %8 = arith.mulf %7, %7 : vector<64x32xf32>
    %cst_4 = arith.constant dense<0.000000e+00> : vector<64xf32>
    %9 = vector.multi_reduction <add>, %8, %cst_4 [1] : vector<64x32xf32> to vector<64xf32>
    %10 = vector.shape_cast %9 : vector<64xf32> to vector<64x1xf32>
    %cst_5 = arith.constant 3.125000e-02 : f32
    %11 = vector.broadcast %cst_5 : f32 to vector<64x1xf32>
    %12 = arith.mulf %10, %11 : vector<64x1xf32>
    %cst_6 = arith.constant 9.99999974E-6 : f32
    %13 = vector.broadcast %cst_6 : f32 to vector<64x1xf32>
    %14 = arith.addf %12, %13 : vector<64x1xf32>
    %15 = math.rsqrt %14 : vector<64x1xf32>
    %16 = vector.broadcast %15 : vector<64x1xf32> to vector<64x32xf32>
    %17 = arith.mulf %7, %16 : vector<64x32xf32>
    %c0_7 = arith.constant 0 : index
    %c0_8 = arith.constant 0 : index
    %18 = vector.load %arg3[%c0_7, %c0_8] : memref<1x32xf32, #tpu.memory_space<vmem>>, vector<1x32xf32>
    %19 = vector.broadcast %18 : vector<1x32xf32> to vector<64x32xf32>
    %20 = arith.mulf %17, %19 : vector<64x32xf32>
    %c0_9 = arith.constant 0 : index
    %c0_10 = arith.constant 0 : index
    %21 = vector.load %arg4[%c0_9, %c0_10] : memref<1x32xf32, #tpu.memory_space<vmem>>, vector<1x32xf32>
    %22 = vector.broadcast %21 : vector<1x32xf32> to vector<64x32xf32>
    %23 = arith.addf %20, %22 : vector<64x32xf32>
    %24 = vector.broadcast %1 : vector<64x1xf32> to vector<64x32xf32>
    %25 = arith.mulf %23, %24 : vector<64x32xf32>
    %26 = arith.truncf %25 : vector<64x32xf32> to vector<64x32xbf16>
    %c0_11 = arith.constant 0 : index
    %c0_12 = arith.constant 0 : index
    %27 = vector.load %arg5[%c0_11, %c0_12] : memref<32x128xbf16, #tpu.memory_space<vmem>>, vector<32x128xbf16>
    %cst_13 = arith.constant dense<0.000000e+00> : vector<64x128xf32>
    %28 = tpu.matmul %26, %27, %cst_13 {dimension_numbers = #tpu.dot_dimension_numbers<[1], [0], [0], [1], [0, 0, 1, 1], [], []>} : vector<64x32xbf16>, vector<32x128xbf16>, vector<64x128xf32> -> vector<64x128xf32>
    %c0_14 = arith.constant 0 : index
    %c0_15 = arith.constant 0 : index
    %29 = vector.load %arg6[%c0_14, %c0_15] : memref<1x128xf32, #tpu.memory_space<vmem>>, vector<1x128xf32>
    %30 = vector.broadcast %29 : vector<1x128xf32> to vector<64x128xf32>
    %31 = arith.addf %28, %30 : vector<64x128xf32>
    %32 = arith.negf %31 : vector<64x128xf32>
    %33 = math.exp %32 : vector<64x128xf32>
    %cst_16 = arith.constant 1.000000e+00 : f32
    %34 = vector.broadcast %cst_16 : f32 to vector<64x128xf32>
    %35 = arith.addf %34, %33 : vector<64x128xf32>
    %36 = arith.divf %34, %35 : vector<64x128xf32>
    %37 = arith.mulf %31, %36 : vector<64x128xf32>
    %38 = arith.truncf %37 : vector<64x128xf32> to vector<64x128xbf16>
    %c0_17 = arith.constant 0 : index
    %c0_18 = arith.constant 0 : index
    %39 = vector.load %arg7[%c0_17, %c0_18] : memref<128x128xbf16, #tpu.memory_space<vmem>>, vector<128x128xbf16>
    %cst_19 = arith.constant dense<0.000000e+00> : vector<64x128xf32>
    %40 = tpu.matmul %38, %39, %cst_19 {dimension_numbers = #tpu.dot_dimension_numbers<[1], [0], [0], [1], [0, 0, 1, 1], [], []>} : vector<64x128xbf16>, vector<128x128xbf16>, vector<64x128xf32> -> vector<64x128xf32>
    %41 = arith.truncf %0 : vector<64x32xf32> to vector<64x32xbf16>
    %c0_20 = arith.constant 0 : index
    %c0_21 = arith.constant 0 : index
    %42 = vector.load %arg8[%c0_20, %c0_21] : memref<32x128xbf16, #tpu.memory_space<vmem>>, vector<32x128xbf16>
    %cst_22 = arith.constant dense<0.000000e+00> : vector<64x128xf32>
    %43 = tpu.matmul %41, %42, %cst_22 {dimension_numbers = #tpu.dot_dimension_numbers<[1], [0], [0], [1], [0, 0, 1, 1], [], []>} : vector<64x32xbf16>, vector<32x128xbf16>, vector<64x128xf32> -> vector<64x128xf32>
    %44 = arith.addf %40, %43 : vector<64x128xf32>
    %45 = vector.broadcast %1 : vector<64x1xf32> to vector<64x128xf32>
    %46 = arith.mulf %45, %44 : vector<64x128xf32>
    %c0_23 = arith.constant 0 : index
    %c0_24 = arith.constant 0 : index
    %47 = vector.load %arg9[%c0_23, %c0_24] : memref<1x128xf32, #tpu.memory_space<vmem>>, vector<1x128xf32>
    %48 = vector.broadcast %47 : vector<1x128xf32> to vector<64x128xf32>
    %49 = arith.addf %46, %48 : vector<64x128xf32>
    %c0_25 = arith.constant 0 : index
    %c0_26 = arith.constant 0 : index
    %50 = vector.load %arg10[%c0_25, %c0_26] : memref<64x128xf32, #tpu.memory_space<vmem>>, vector<64x128xf32>
    tpu.vector_store %arg10[%c0_25, %c0_26], %49 {strides = array<i32>} : memref<64x128xf32, #tpu.memory_space<vmem>>, vector<64x128xf32>,
    return
  }
  func.func @transform_0(%arg0: i32) -> (i32, i32) {
    %c0_i32 = arith.constant 0 : i32
    %c0_i32_0 = arith.constant 0 : i32
    return %arg0, %c0_i32 : i32, i32
  }
  func.func @transform_1(%arg0: i32) -> (i32, i32) {
    %c0_i32 = arith.constant 0 : i32
    %c0_i32_0 = arith.constant 0 : i32
    return %arg0, %c0_i32 : i32, i32
  }
  func.func @transform_2(%arg0: i32) -> (i32, i32) {
    %c0_i32 = arith.constant 0 : i32
    %c0_i32_0 = arith.constant 0 : i32
    %c0_i32_1 = arith.constant 0 : i32
    return %c0_i32, %c0_i32_0 : i32, i32
  }
  func.func @transform_3(%arg0: i32) -> (i32, i32) {
    %c0_i32 = arith.constant 0 : i32
    %c0_i32_0 = arith.constant 0 : i32
    %c0_i32_1 = arith.constant 0 : i32
    return %c0_i32, %c0_i32_0 : i32, i32
  }
  func.func @transform_4(%arg0: i32) -> (i32, i32) {
    %c0_i32 = arith.constant 0 : i32
    %c0_i32_0 = arith.constant 0 : i32
    %c0_i32_1 = arith.constant 0 : i32
    return %c0_i32, %c0_i32_0 : i32, i32
  }
  func.func @transform_5(%arg0: i32) -> (i32, i32) {
    %c0_i32 = arith.constant 0 : i32
    %c0_i32_0 = arith.constant 0 : i32
    %c0_i32_1 = arith.constant 0 : i32
    return %c0_i32, %c0_i32_0 : i32, i32
  }
  func.func @transform_6(%arg0: i32) -> (i32, i32) {
    %c0_i32 = arith.constant 0 : i32
    %c0_i32_0 = arith.constant 0 : i32
    %c0_i32_1 = arith.constant 0 : i32
    return %c0_i32, %c0_i32_0 : i32, i32
  }
  func.func @transform_7(%arg0: i32) -> (i32, i32) {
    %c0_i32 = arith.constant 0 : i32
    %c0_i32_0 = arith.constant 0 : i32
    %c0_i32_1 = arith.constant 0 : i32
    return %c0_i32, %c0_i32_0 : i32, i32
  }
  func.func @transform_8(%arg0: i32) -> (i32, i32) {
    %c0_i32 = arith.constant 0 : i32
    %c0_i32_0 = arith.constant 0 : i32
    %c0_i32_1 = arith.constant 0 : i32
    return %c0_i32, %c0_i32_0 : i32, i32
  }
  func.func @transform_9(%arg0: i32) -> (i32, i32) {
    %c0_i32 = arith.constant 0 : i32
    %c0_i32_0 = arith.constant 0 : i32
    return %arg0, %c0_i32 : i32, i32
  }
}

module attributes {stable_mosaic.version = 11 : i64} {
  func.func @_ffres_kernel(%arg0: i32, %arg1: memref<64x32xf32, #tpu.memory_space<vmem>>, %arg2: memref<64x1xf32, #tpu.memory_space<vmem>>, %arg3: memref<1x32xf32, #tpu.memory_space<vmem>>, %arg4: memref<1x32xf32, #tpu.memory_space<vmem>>, %arg5: memref<32x128xbf16, #tpu.memory_space<vmem>>, %arg6: memref<1x128xf32, #tpu.memory_space<vmem>>, %arg7: memref<128x128xbf16, #tpu.memory_space<vmem>>, %arg8: memref<32x128xbf16, #tpu.memory_space<vmem>>, %arg9: memref<1x128xf32, #tpu.memory_space<vmem>>, %arg10: memref<64x128xf32, #tpu.memory_space<vmem>>) attributes {dimension_semantics = [#tpu.dimension_semantics<parallel>], iteration_bounds = array<i64: 1>, scalar_prefetch = 0 : i64, scratch_operands = 0 : i64, tpu.core_type = #tpu.core_type<tc>, window_params = [{transform_indices = @transform_0, window_bounds = array<i64: 64, 32>}, {transform_indices = @transform_1, window_bounds = array<i64: 64, 1>}, {pipeline_mode = #tpu.pipeline_mode<synchronous>, transform_indices = @transform_2, window_bounds = array<i64: 1, 32>}, {pipeline_mode = #tpu.pipeline_mode<synchronous>, transform_indices = @transform_3, window_bounds = array<i64: 1, 32>}, {pipeline_mode = #tpu.pipeline_mode<synchronous>, transform_indices = @transform_4, window_bounds = array<i64: 32, 128>}, {pipeline_mode = #tpu.pipeline_mode<synchronous>, transform_indices = @transform_5, window_bounds = array<i64: 1, 128>}, {pipeline_mode = #tpu.pipeline_mode<synchronous>, transform_indices = @transform_6, window_bounds = array<i64: 128, 128>}, {pipeline_mode = #tpu.pipeline_mode<synchronous>, transform_indices = @transform_7, window_bounds = array<i64: 32, 128>}, {pipeline_mode = #tpu.pipeline_mode<synchronous>, transform_indices = @transform_8, window_bounds = array<i64: 1, 128>}, {transform_indices = @transform_9, window_bounds = array<i64: 64, 128>}]} {
    %c0 = arith.constant 0 : index
    %c0_0 = arith.constant 0 : index
    %0 = vector.load %arg1[%c0, %c0_0] : memref<64x32xf32, #tpu.memory_space<vmem>>, vector<64x32xf32>
    %c0_1 = arith.constant 0 : index
    %c0_2 = arith.constant 0 : index
    %1 = vector.load %arg2[%c0_1, %c0_2] : memref<64x1xf32, #tpu.memory_space<vmem>>, vector<64x1xf32>
    %cst = arith.constant dense<0.000000e+00> : vector<64xf32>
    %2 = vector.multi_reduction <add>, %0, %cst [1] : vector<64x32xf32> to vector<64xf32>
    %3 = vector.shape_cast %2 : vector<64xf32> to vector<64x1xf32>
    %cst_3 = arith.constant 3.125000e-02 : f32
    %4 = vector.broadcast %cst_3 : f32 to vector<64x1xf32>
    %5 = arith.mulf %3, %4 : vector<64x1xf32>
    %6 = vector.broadcast %5 : vector<64x1xf32> to vector<64x32xf32>
    %7 = arith.subf %0, %6 : vector<64x32xf32>
    %8 = arith.mulf %7, %7 : vector<64x32xf32>
    %cst_4 = arith.constant dense<0.000000e+00> : vector<64xf32>
    %9 = vector.multi_reduction <add>, %8, %cst_4 [1] : vector<64x32xf32> to vector<64xf32>
    %10 = vector.shape_cast %9 : vector<64xf32> to vector<64x1xf32>
    %cst_5 = arith.constant 3.125000e-02 : f32
    %11 = vector.broadcast %cst_5 : f32 to vector<64x1xf32>
    %12 = arith.mulf %10, %11 : vector<64x1xf32>
    %cst_6 = arith.constant 9.99999974E-6 : f32
    %13 = vector.broadcast %cst_6 : f32 to vector<64x1xf32>
    %14 = arith.addf %12, %13 : vector<64x1xf32>
    %15 = math.rsqrt %14 : vector<64x1xf32>
    %16 = vector.broadcast %15 : vector<64x1xf32> to vector<64x32xf32>
    %17 = arith.mulf %7, %16 : vector<64x32xf32>
    %c0_7 = arith.constant 0 : index
    %c0_8 = arith.constant 0 : index
    %18 = vector.load %arg3[%c0_7, %c0_8] : memref<1x32xf32, #tpu.memory_space<vmem>>, vector<1x32xf32>
    %19 = vector.broadcast %18 : vector<1x32xf32> to vector<64x32xf32>
    %20 = arith.mulf %17, %19 : vector<64x32xf32>
    %c0_9 = arith.constant 0 : index
    %c0_10 = arith.constant 0 : index
    %21 = vector.load %arg4[%c0_9, %c0_10] : memref<1x32xf32, #tpu.memory_space<vmem>>, vector<1x32xf32>
    %22 = vector.broadcast %21 : vector<1x32xf32> to vector<64x32xf32>
    %23 = arith.addf %20, %22 : vector<64x32xf32>
    %24 = vector.broadcast %1 : vector<64x1xf32> to vector<64x32xf32>
    %25 = arith.mulf %23, %24 : vector<64x32xf32>
    %26 = arith.truncf %25 : vector<64x32xf32> to vector<64x32xbf16>
    %c0_11 = arith.constant 0 : index
    %c0_12 = arith.constant 0 : index
    %27 = vector.load %arg5[%c0_11, %c0_12] : memref<32x128xbf16, #tpu.memory_space<vmem>>, vector<32x128xbf16>
    %cst_13 = arith.constant dense<0.000000e+00> : vector<64x128xf32>
    %28 = tpu.matmul %26, %27, %cst_13 {dimension_numbers = #tpu.dot_dimension_numbers<[1], [0], [0], [1], [0, 0, 1, 1], [], []>} : vector<64x32xbf16>, vector<32x128xbf16>, vector<64x128xf32> -> vector<64x128xf32>
    %c0_14 = arith.constant 0 : index
    %c0_15 = arith.constant 0 : index
    %29 = vector.load %arg6[%c0_14, %c0_15] : memref<1x128xf32, #tpu.memory_space<vmem>>, vector<1x128xf32>
    %30 = vector.broadcast %29 : vector<1x128xf32> to vector<64x128xf32>
    %31 = arith.addf %28, %30 : vector<64x128xf32>
    %32 = arith.negf %31 : vector<64x128xf32>
    %33 = math.exp %32 : vector<64x128xf32>
    %cst_16 = arith.constant 1.000000e+00 : f32
    %34 = vector.broadcast %cst_16 : f32 to vector<64x128xf32>
    %35 = arith.addf %34, %33 : vector<64x128xf32>
    %36 = arith.divf %34, %35 : vector<64x128xf32>
    %37 = arith.mulf %31, %36 : vector<64x128xf32>
    %38 = arith.truncf %37 : vector<64x128xf32> to vector<64x128xbf16>
    %c0_17 = arith.constant 0 : index
    %c0_18 = arith.constant 0 : index
    %39 = vector.load %arg7[%c0_17, %c0_18] : memref<128x128xbf16, #tpu.memory_space<vmem>>, vector<128x128xbf16>
    %cst_19 = arith.constant dense<0.000000e+00> : vector<64x128xf32>
    %40 = tpu.matmul %38, %39, %cst_19 {dimension_numbers = #tpu.dot_dimension_numbers<[1], [0], [0], [1], [0, 0, 1, 1], [], []>} : vector<64x128xbf16>, vector<128x128xbf16>, vector<64x128xf32> -> vector<64x128xf32>
    %41 = arith.truncf %0 : vector<64x32xf32> to vector<64x32xbf16>
    %c0_20 = arith.constant 0 : index
    %c0_21 = arith.constant 0 : index
    %42 = vector.load %arg8[%c0_20, %c0_21] : memref<32x128xbf16, #tpu.memory_space<vmem>>, vector<32x128xbf16>
    %cst_22 = arith.constant dense<0.000000e+00> : vector<64x128xf32>
    %43 = tpu.matmul %41, %42, %cst_22 {dimension_numbers = #tpu.dot_dimension_numbers<[1], [0], [0], [1], [0, 0, 1, 1], [], []>} : vector<64x32xbf16>, vector<32x128xbf16>, vector<64x128xf32> -> vector<64x128xf32>
    %44 = arith.addf %40, %43 : vector<64x128xf32>
    %45 = vector.broadcast %1 : vector<64x1xf32> to vector<64x128xf32>
    %46 = arith.mulf %45, %44 : vector<64x128xf32>
    %c0_23 = arith.constant 0 : index
    %c0_24 = arith.constant 0 : index
    %47 = vector.load %arg9[%c0_23, %c0_24] : memref<1x128xf32, #tpu.memory_space<vmem>>, vector<1x128xf32>
    %48 = vector.broadcast %47 : vector<1x128xf32> to vector<64x128xf32>
    %49 = arith.addf %46, %48 : vector<64x128xf32>
    %c0_25 = arith.constant 0 : index
    %c0_26 = arith.constant 0 : index
    %50 = vector.load %arg10[%c0_25, %c0_26] : memref<64x128xf32, #tpu.memory_space<vmem>>, vector<64x128xf32>
    tpu.vector_store %arg10[%c0_25, %c0_26], %49 {strides = array<i32>} : memref<64x128xf32, #tpu.memory_space<vmem>>, vector<64x128xf32>,
    return
  }
  func.func @transform_0(%arg0: i32) -> (i32, i32) {
    %c0_i32 = arith.constant 0 : i32
    %c0_i32_0 = arith.constant 0 : i32
    return %arg0, %c0_i32 : i32, i32
  }
  func.func @transform_1(%arg0: i32) -> (i32, i32) {
    %c0_i32 = arith.constant 0 : i32
    %c0_i32_0 = arith.constant 0 : i32
    return %arg0, %c0_i32 : i32, i32
  }
  func.func @transform_2(%arg0: i32) -> (i32, i32) {
    %c0_i32 = arith.constant 0 : i32
    %c0_i32_0 = arith.constant 0 : i32
    %c0_i32_1 = arith.constant 0 : i32
    return %c0_i32, %c0_i32_0 : i32, i32
  }
  func.func @transform_3(%arg0: i32) -> (i32, i32) {
    %c0_i32 = arith.constant 0 : i32
    %c0_i32_0 = arith.constant 0 : i32
    %c0_i32_1 = arith.constant 0 : i32
    return %c0_i32, %c0_i32_0 : i32, i32
  }
  func.func @transform_4(%arg0: i32) -> (i32, i32) {
    %c0_i32 = arith.constant 0 : i32
    %c0_i32_0 = arith.constant 0 : i32
    %c0_i32_1 = arith.constant 0 : i32
    return %c0_i32, %c0_i32_0 : i32, i32
  }
  func.func @transform_5(%arg0: i32) -> (i32, i32) {
    %c0_i32 = arith.constant 0 : i32
    %c0_i32_0 = arith.constant 0 : i32
    %c0_i32_1 = arith.constant 0 : i32
    return %c0_i32, %c0_i32_0 : i32, i32
  }
  func.func @transform_6(%arg0: i32) -> (i32, i32) {
    %c0_i32 = arith.constant 0 : i32
    %c0_i32_0 = arith.constant 0 : i32
    %c0_i32_1 = arith.constant 0 : i32
    return %c0_i32, %c0_i32_0 : i32, i32
  }
  func.func @transform_7(%arg0: i32) -> (i32, i32) {
    %c0_i32 = arith.constant 0 : i32
    %c0_i32_0 = arith.constant 0 : i32
    %c0_i32_1 = arith.constant 0 : i32
    return %c0_i32, %c0_i32_0 : i32, i32
  }
  func.func @transform_8(%arg0: i32) -> (i32, i32) {
    %c0_i32 = arith.constant 0 : i32
    %c0_i32_0 = arith.constant 0 : i32
    %c0_i32_1 = arith.constant 0 : i32
    return %c0_i32, %c0_i32_0 : i32, i32
  }
  func.func @transform_9(%arg0: i32) -> (i32, i32) {
    %c0_i32 = arith.constant 0 : i32
    %c0_i32_0 = arith.constant 0 : i32
    return %arg0, %c0_i32 : i32, i32
  }
}

</mosaic_0001>

<bundles_post_ra>
// kernel: tpu_custom_call.1
= control target key start
LH: loop header
LB: loop body
LE: loop exit
PB: predicated region body
PF: predicated region fallthrough
CT: control target
= control target key end

     0   :  { %vm50_vm0 = vcmask 261120   ;;  %s1170_s0 = inlined_call_operand.vmem [shape: f32[64,32], index: 0, kind: input, shape index: {}]   ;;  %s1171_s1 = inlined_call_operand.vmem [shape: f32[64,1], index: 1, kind: input, shape index: {}]   ;;  %s1172_s2 = inlined_call_operand.vmem [shape: f32[1,32], index: 2, kind: input, shape index: {}]   ;;  %s1173_s3 = inlined_call_operand.vmem [shape: f32[1,32], index: 3, kind: input, shape index: {}]   ;;  %s1174_s4 = inlined_call_operand.vmem [shape: bf16[32,128], index: 4, kind: input, shape index: {}]   ;;  %s1175_s5 = inlined_call_operand.vmem [shape: f32[1,128], index: 5, kind: input, shape index: {}]   ;;  %s1176_s6 = inlined_call_operand.vmem [shape: bf16[128,128], index: 6, kind: input, shape index: {}]   ;;  %s1177_s7 = inlined_call_operand.vmem [shape: bf16[32,128], index: 7, kind: input, shape index: {}]   ;;  %s1178_s8 = inlined_call_operand.vmem [shape: f32[1,128], index: 8, kind: input, shape index: {}]   ;;  %s1179_s9 = inlined_call_operand.hbm [shape: f32[64,128], index: 9, kind: output, shape index: {}]  }
   0x1   :  { %v929_v0 = vld [vmem:[%s1170_s0] sm:$0xff]  ;;  %v934_v1 = vld [vmem:[%s1170_s0 + $0x10] sm:$0xff]  ;;  %v939_v2 = vld [vmem:[%s1170_s0 + $0x8] sm:$0xff] }
   0x2   :  { %v51_v3 = vsel %vm50_vm0, %v929_v0, 0.0  ;;  %v57_v4 = vsel %vm50_vm0, %v934_v1, 0.0  ;;  %v948_v5 = vld [vmem:[%s1170_s0 + $0x18] sm:$0xff]  ;;  %v953_v6 = vld [vmem:[%s1170_s0 + $0x20] sm:$0xff]  ;;  %v958_v7 = vld [vmem:[%s1170_s0 + $0x28] sm:$0xff]  ;;  %v54_v8 = vsel %vm50_vm0, %v939_v2, 0.0 }
   0x3   :  { %52 = vadd.xlane.f32.xlu0 %v51_v3  ;;  %58 = vadd.xlane.f32.xlu1 %v57_v4  ;;  %v60_v9 = vsel %vm50_vm0, %v948_v5, 0.0  ;;  %v63_v10 = vsel %vm50_vm0, %v953_v6, 0.0  ;;  %v66_v11 = vsel %vm50_vm0, %v958_v7, 0.0  ;;  %v971_v12 = vld [vmem:[%s1170_s0 + $0x30] sm:$0xff]  ;;  %v976_v13 = vld [vmem:[%s1170_s0 + $0x38] sm:$0xff] }
   0x4   :  { %v69_v14 = vsel %vm50_vm0, %v971_v12, 0.0  ;;  %v72_v15 = vsel %vm50_vm0, %v976_v13, 0.0 }
   0x7   :  { %55 = vadd.xlane.f32.xlu0 %v54_v8  ;;  %61 = vadd.xlane.f32.xlu1 %v60_v9 }
   0xb   :  { %64 = vadd.xlane.f32.xlu0 %v63_v10  ;;  %67 = vadd.xlane.f32.xlu1 %v66_v11 }
   0xc   :  { %14 = vsyncpa [#allocation3], 0  ;;  %v872_v16 = vmov 0   ;;  %v43_v52 = vld [vmem:[%s1171_s1 + $0x8] sm:$0xff]  ;;  %v44_v53 = vld [vmem:[%s1171_s1 + $0x10] sm:$0xff] }
   0xd   :  { %787 = vset.pattern.permute.xlu1 %v872_v16  ;;  %786 = vset.pattern.permute.xlu0 %v872_v16  ;;  %v42_v54 = vld [vmem:[%s1171_s1] sm:$0xff]  ;;  %v45_v55 = vld [vmem:[%s1171_s1 + $0x18] sm:$0xff]  ;;  %v47_v58 = vld [vmem:[%s1171_s1 + $0x28] sm:$0xff] }
   0xe   :  { %v46_v56 = vld [vmem:[%s1171_s1 + $0x20] sm:$0xff]  ;;  %v789_v59 = vld [vmem:[%s1174_s4 + $0x8] sm:$0xff]   ;;  %v48_v60 = vld [vmem:[%s1171_s1 + $0x30] sm:$0xff] }
   0xf   :  { %70 = vadd.xlane.f32.xlu0 %v69_v14  ;;  %73 = vadd.xlane.f32.xlu1 %v72_v15  ;;  %v788_v57 = vld [vmem:[%s1174_s4] sm:$0xff]   ;;  %v49_v8 = vld [vmem:[%s1171_s1 + $0x38] sm:$0xff] }
  0x10   :  { %726 = vmatprep.subr.bf16.mxu0 %v788_v57 }
  0x11   :  { %727 = vmatpush3.bf16.msra.mxu0 %v788_v57 }
  0x12   :  { %728 = vmatprep.subr.bf16.mxu0 %v789_v59 }
  0x15   :  { %729 = vmatpush3.bf16.msra.mxu0 %v789_v59 }
  0x90   :  { %v53_v17 = vpop.xlane.xlu0 %52  ;;  %v59_v18 = vpop.xlane.xlu1 %58 }
  0x91   :  { %v75_v19 = vmul.f32 0.03125, %v53_v17  ;;  %v77_v20 = vmul.f32 0.03125, %v59_v18 }
  0x93   :  { %v983_v21 = vsub.f32 %v929_v0, %v75_v19  ;;  %v986_v22 = vsub.f32 %v934_v1, %v77_v20 }
  0x94   :  { %v56_v23 = vpop.xlane.xlu0 %55  ;;  %v62_v24 = vpop.xlane.xlu1 %61 }
  0x95   :  { %v76_v25 = vmul.f32 0.03125, %v56_v23  ;;  %v78_v26 = vmul.f32 0.03125, %v62_v24  ;;  %v91_v27 = vmul.f32 %v983_v21, %v983_v21  ;;  %v93_v28 = vmul.f32 %v986_v22, %v986_v22 }
  0x97   :  { %v993_v29 = vsub.f32 %v939_v2, %v76_v25  ;;  %v996_v30 = vsub.f32 %v948_v5, %v78_v26  ;;  %v99_v31 = vsel %vm50_vm0, %v91_v27, 0.0  ;;  %v105_v34 = vsel %vm50_vm0, %v93_v28, 0.0 }
  0x98   :  { %100 = vadd.xlane.f32.xlu0 %v99_v31  ;;  %v65_v32 = vpop.xlane.xlu0 %64  ;;  %v68_v33 = vpop.xlane.xlu1 %67 }
  0x99   :  { %v79_v35 = vmul.f32 0.03125, %v65_v32  ;;  %v80_v36 = vmul.f32 0.03125, %v68_v33  ;;  %v92_v37 = vmul.f32 %v993_v29, %v993_v29  ;;  %v94_v38 = vmul.f32 %v996_v30, %v996_v30 }
  0x9b   :  { %v1005_v39 = vsub.f32 %v953_v6, %v79_v35  ;;  %v1008_v40 = vsub.f32 %v958_v7, %v80_v36  ;;  %v102_v41 = vsel %vm50_vm0, %v92_v37, 0.0  ;;  %v108_v44 = vsel %vm50_vm0, %v94_v38, 0.0 }
  0x9c   :  { %106 = vadd.xlane.f32.xlu0 %v105_v34  ;;  %103 = vadd.xlane.f32.xlu1 %v102_v41  ;;  %v71_v42 = vpop.xlane.xlu0 %70  ;;  %v74_v61 = vpop.xlane.xlu1 %73  ;;  %v670_v34 = vld [vmem:[%s1172_s2] ss:$0 sm:$0xff] }
  0x9d   :  { %v81_v43 = vmul.f32 0.03125, %v71_v42  ;;  %v95_v45 = vmul.f32 %v1005_v39, %v1005_v39  ;;  %v96_v46 = vmul.f32 %v1008_v40, %v1008_v40  ;;  %v82_v62 = vmul.f32 0.03125, %v74_v61  ;;  %v671_v42 = vld [vmem:[%s1173_s3] ss:$0 sm:$0xff] }
  0x9f   :  { %v1017_v47 = vsub.f32 %v971_v12, %v81_v43  ;;  %v111_v48 = vsel %vm50_vm0, %v95_v45, 0.0  ;;  %v114_v49 = vsel %vm50_vm0, %v96_v46, 0.0  ;;  %v1052_v63 = vsub.f32 %v976_v13, %v82_v62 }
  0xa0   :  { %109 = vadd.xlane.f32.xlu1 %v108_v44  ;;  %112 = vadd.xlane.f32.xlu0 %v111_v48 }
  0xa1   :  { %v97_v50 = vmul.f32 %v1017_v47, %v1017_v47  ;;  %v98_v3 = vmul.f32 %v1052_v63, %v1052_v63 }
  0xa3   :  { %v117_v51 = vsel %vm50_vm0, %v97_v50, 0.0  ;;  %v120_v4 = vsel %vm50_vm0, %v98_v3, 0.0 }
  0xa4   :  { %115 = vadd.xlane.f32.xlu1 %v114_v49  ;;  %118 = vadd.xlane.f32.xlu0 %v117_v51 }
  0xb5   :  { %192 = vperm.xlu1 %787, %v43_v52  }
  0xb9   :  { %197 = vperm.xlu1 %787, %v44_v53  }
  0xba   :  { %187 = vperm.xlu0 %786, %v42_v54  }
  0xbd   :  { %202 = vperm.xlu1 %787, %v45_v55  }
  0xc1   :  { %207 = vperm.xlu1 %787, %v46_v56  }
  0xc5   :  { %212 = vperm.xlu1 %787, %v47_v58  }
  0xc9   :  { %217 = vperm.xlu1 %787, %v48_v60  }
  0xed   :  { %121 = vadd.xlane.f32.xlu1 %v120_v4 }
  0xfe   :  { %222 = vperm.xlu1 %787, %v49_v8  }
 0x125   :  { %v101_v9 = vpop.xlane.xlu0 %100 }
 0x126   :  { %v123_v10 = vmul.f32 0.03125, %v101_v9 }
 0x128   :  { %v131_v11 = vadd.f32 1e-05, %v123_v10 }
 0x129   :  { %v104_v14 = vpop.xlane.xlu1 %103  ;;  %v107_v15 = vpop.xlane.xlu0 %106 }
 0x12a   :  { %800 = vrsqrt.f32 %v131_v11  ;;  %v124_v16 = vmul.f32 0.03125, %v104_v14  ;;  %v125_v17 = vmul.f32 0.03125, %v107_v15 }
 0x12c   :  { %v132_v18 = vadd.f32 1e-05, %v124_v16  ;;  %v133_v19 = vadd.f32 1e-05, %v125_v17 }
 0x12d   :  { %v110_v20 = vpop.xlane.xlu1 %109  ;;  %v113_v23 = vpop.xlane.xlu0 %112 }
 0x12e   :  { %802 = vrsqrt.f32 %v132_v18  ;;  %v126_v24 = vmul.f32 0.03125, %v110_v20  ;;  %v127_v25 = vmul.f32 0.03125, %v113_v23 }
 0x12f   :  { %804 = vrsqrt.f32 %v133_v19 }
 0x130   :  { %v134_v26 = vadd.f32 1e-05, %v126_v24  ;;  %v135_v27 = vadd.f32 1e-05, %v127_v25 }
 0x131   :  { %v116_v28 = vpop.xlane.xlu1 %115  ;;  %v119_v41 = vpop.xlane.xlu0 %118 }
 0x132   :  { %806 = vrsqrt.f32 %v134_v26  ;;  %v128_v31 = vmul.f32 0.03125, %v116_v28 }
 0x133   :  { %808 = vrsqrt.f32 %v135_v27 }
 0x134   :  { %v801_v32 = vpop.eup %800  ;;  %v136_v33 = vadd.f32 1e-05, %v128_v31 }
 0x135   :  { %v1063_v35 = vpop.permute.xlu1 %192  ;;  %v147_v36 = vmul.f32 %v801_v32, %v983_v21 }
 0x136   :  { %810 = vrsqrt.f32 %v136_v33 }
 0x137   :  { %v162_v37 = vmul.f32 %v670_v34, %v147_v36 }
 0x138   :  { %v803_v38 = vpop.eup %802 }
 0x139   :  { %v805_v43 = vpop.eup %804  ;;  %v148_v44 = vmul.f32 %v803_v38, %v993_v29  ;;  %v1070_v45 = vpop.permute.xlu1 %197  ;;  %v177_v49 = vadd.f32 %v671_v42, %v162_v37 }
 0x13a   :  { %v149_v46 = vmul.f32 %v805_v43, %v986_v22  ;;  %v1073_v21 = vpop.permute.xlu0 %187  ;;  %v413_v43 = vpack.c.bf16 %v939_v2, %v929_v0  ;;  %v792_v0 = vld [vmem:[%s1176_s6 + $0x10] sm:$0xff]   ;;  %v793_v2 = vld [vmem:[%s1176_s6 + $0x18] sm:$0xff]  }
 0x13b   :  { %v163_v48 = vmul.f32 %v670_v34, %v148_v44  ;;  %v225_v58 = vmul.f32 %v1073_v21, %v177_v49  ;;  %v798_v49 = vld [vmem:[%s1177_s7 + $0x8] sm:$0xff]  }
 0x13c   :  { %v807_v50 = vpop.eup %806  ;;  %v164_v51 = vmul.f32 %v670_v34, %v149_v46  ;;  %v796_v46 = vld [vmem:[%s1177_s7] sm:$0xff]  }
 0x13d   :  { %v809_v52 = vpop.eup %808  ;;  %v178_v53 = vadd.f32 %v671_v42, %v163_v48  ;;  %v150_v54 = vmul.f32 %v807_v50, %v996_v30  ;;  %v1076_v55 = vpop.permute.xlu1 %202  ;;  %v797_v48 = vld [vmem:[%s1176_s6 + $0x30] sm:$0xff]   ;;  %738 = vmatprep.subr.bf16.mxu0 %v796_v46  ;;  %v799_v50 = vld [vmem:[%s1176_s6 + $0x38] sm:$0xff]  }
 0x13e   :  { %v151_v56 = vmul.f32 %v809_v52, %v1005_v39  ;;  %v179_v57 = vadd.f32 %v671_v42, %v164_v51  ;;  %v414_v51 = vpack.c.bf16 %v948_v5, %v934_v1  ;;  %v415_v52 = vpack.c.bf16 %v958_v7, %v953_v6 }
 0x13f   :  { %v226_v29 = vmul.f32 %v1063_v35, %v178_v53  ;;  %v165_v22 = vmul.f32 %v670_v34, %v150_v54  ;;  %v416_v53 = vpack.c.bf16 %v976_v13, %v971_v12  ;;  %v672_v54 = vld [vmem:[%s1175_s5] ss:$0 sm:$0xff] }
 0x140   :  { %v811_v59 = vpop.eup %810  ;;  %v166_v60 = vmul.f32 %v670_v34, %v151_v56  ;;  %v227_v30 = vmul.f32 %v1070_v45, %v179_v57 }
 0x141   :  { %v180_v61 = vadd.f32 %v671_v42, %v165_v22  ;;  %v1081_v62 = vpop.permute.xlu1 %207  ;;  %v233_v3 = vpack.c.bf16 %v226_v29, %v225_v58  ;;  %v152_v4 = vmul.f32 %v811_v59, %v1008_v40  ;;  %v129_v40 = vmul.f32 0.03125, %v119_v41 }
 0x142   :  { %v181_v9 = vadd.f32 %v671_v42, %v166_v60 }
 0x143   :  { %v228_v8 = vmul.f32 %v1076_v55, %v180_v61  ;;  %730 = vmatprep.mubr.msk.bf16.mxu0 %vm50_vm0, %v233_v3  ;;  %v167_v39 = vmul.f32 %v670_v34, %v152_v4  ;;  %v137_v18 = vadd.f32 1e-05, %v129_v40 }
 0x144   :  { %v229_v15 = vmul.f32 %v1081_v62, %v181_v9 }
 0x145   :  { %v234_v10 = vpack.c.bf16 %v228_v8, %v227_v30  ;;  %v182_v11 = vadd.f32 %v671_v42, %v167_v39  ;;  %v1087_v14 = vpop.permute.xlu1 %212  ;;  %812 = vrsqrt.f32 %v137_v18 }
 0x147   :  { %v230_v16 = vmul.f32 %v1087_v14, %v182_v11  ;;  %731 = vmatmul.mubr.msk.bf16.vlgmr.msra.gmra.mrb[0].mxu0 %vm50_vm0, %v234_v10 }
 0x148   :  { %739 = vmatpush3.bf16.msra.mxu0 %v796_v46 }
 0x149   :  { %v235_v17 = vpack.c.bf16 %v230_v16, %v229_v15  ;;  %v1093_v19 = vpop.permute.xlu1 %217  ;;  %740 = vmatprep.subr.bf16.mxu0 %v798_v49 }
 0x14b   :  { %734 = vmatprep.mubr.msk.bf16.mxu0 %vm50_vm0, %v235_v17 }
 0x14c   :  { %741 = vmatpush3.bf16.msra.mxu0 %v798_v49 }
 0x14f   :  { %v813_v25 = vpop.eup %812 }
 0x150   :  { %v153_v26 = vmul.f32 %v813_v25, %v1017_v47  ;;  %v790_v47 = vld [vmem:[%s1176_s6] sm:$0xff]  }
 0x151   :  { %750 = vmatprep.subr.bf16.mxu1 %v790_v47 }
 0x152   :  { %v168_v28 = vmul.f32 %v670_v34, %v153_v26  ;;  %751 = vmatpush3.bf16.msra.mxu1 %v790_v47 }
 0x154   :  { %v183_v33 = vadd.f32 %v671_v42, %v168_v28 }
 0x156   :  { %v231_v38 = vmul.f32 %v1093_v19, %v183_v33 }
 0x17a   :  { %v122_v20 = vpop.xlane.xlu1 %121 }
 0x17b   :  { %v130_v23 = vmul.f32 0.03125, %v122_v20 }
 0x17d   :  { %v138_v24 = vadd.f32 1e-05, %v130_v23 }
 0x17e   :  { %v1097_v37 = vpop.permute.xlu1 %222 }
 0x17f   :  { %814 = vrsqrt.f32 %v138_v24 }
 0x189   :  { %v815_v27 = vpop.eup %814 }
 0x18a   :  { %v154_v31 = vmul.f32 %v815_v27, %v1052_v63  ;;  %v791_v63 = vld [vmem:[%s1176_s6 + $0x8] sm:$0xff]  }
 0x18b   :  { %752 = vmatprep.subr.bf16.mxu1 %v791_v63 }
 0x18c   :  { %v169_v32 = vmul.f32 %v670_v34, %v154_v31  ;;  %753 = vmatpush3.bf16.msra.mxu1 %v791_v63  ;;  %v794_v34 = vld [vmem:[%s1176_s6 + $0x20] sm:$0xff]  }
 0x18d   :  { %754 = vmatprep.subr.bf16.mxu1 %v792_v0 }
 0x18e   :  { %v184_v36 = vadd.f32 %v671_v42, %v169_v32  ;;  %v795_v42 = vld [vmem:[%s1176_s6 + $0x28] sm:$0xff]  }
 0x190   :  { %v232_v41 = vmul.f32 %v1097_v37, %v184_v36  ;;  %755 = vmatpush3.bf16.msra.mxu1 %v792_v0 }
 0x191   :  { %756 = vmatprep.subr.bf16.mxu1 %v793_v2 }
 0x192   :  { %v236_v44 = vpack.c.bf16 %v232_v41, %v231_v38 }
 0x194   :  { %735 = vmatmul.mubr.msk.bf16.gmra.mrb[4].mxu0 %vm50_vm0, %v236_v44  ;;  %757 = vmatpush3.bf16.msra.mxu1 %v793_v2 }
 0x195   :  { %742 = vmatprep.mubr.msk.bf16.mxu0 %vm50_vm0, %v413_v43  ;;  %758 = vmatprep.subr.bf16.mxu1 %v794_v34 }
 0x198   :  { %759 = vmatpush3.bf16.msra.mxu1 %v794_v34 }
 0x199   :  { %760 = vmatprep.subr.bf16.mxu1 %v795_v42 }
 0x19c   :  { %761 = vmatpush3.bf16.msra.mxu1 %v795_v42  ;;  %743 = vmatmul.mubr.msk.bf16.vlgmr.msra.gmra.mrb[8].mxu0 %vm50_vm0, %v414_v51 }
 0x19d   :  { %762 = vmatprep.subr.bf16.mxu1 %v797_v48  ;;  %746 = vmatprep.mubr.msk.bf16.mxu0 %vm50_vm0, %v415_v52 }
 0x1a0   :  { %763 = vmatpush3.bf16.msra.mxu1 %v797_v48 }
 0x1a1   :  { %764 = vmatprep.subr.bf16.mxu1 %v799_v50 }
 0x1a4   :  { %765 = vmatpush3.bf16.msra.mxu1 %v799_v50  ;;  %747 = vmatmul.mubr.msk.bf16.gmra.mrb[12].mxu0 %vm50_vm0, %v416_v53 }
 0x21a   :  { %v732_v56 = vpop.f32.mrb[0].mxu0 }
 0x21b   :  { %v315_v1 = vadd.f32 %v732_v56, %v672_v54  ;;  %v306_v5 = vpop.f32.mrb[1].mxu0 }
 0x21c   :  { %v307_v29 = vadd.f32 %v672_v54, %v306_v5  ;;  %v733_v6 = vpop.f32.mrb[2].mxu0 }
 0x21d   :  { %v681_v7 = vmul.f32 -1.442695, %v315_v1  ;;  %v318_v57 = vadd.f32 %v733_v6, %v672_v54  ;;  %v309_v58 = vpop.f32.mrb[3].mxu0 }
 0x21e   :  { %v679_v22 = vmul.f32 -1.442695, %v307_v29  ;;  %v310_v59 = vadd.f32 %v672_v54, %v309_v58 }
 0x21f   :  { %816 = vpow2.f32 %v681_v7  ;;  %v682_v60 = vmul.f32 -1.442695, %v318_v57 }
 0x220   :  { %818 = vpow2.f32 %v679_v22  ;;  %v680_v12 = vmul.f32 -1.442695, %v310_v59 }
 0x221   :  { %820 = vpow2.f32 %v682_v60 }
 0x222   :  { %822 = vpow2.f32 %v680_v12 }
 0x229   :  { %v817_v13 = vpop.eup %816 }
 0x22a   :  { %v819_v61 = vpop.eup %818  ;;  %v363_v3 = vadd.f32 1.0, %v817_v13 }
 0x22b   :  { %v821_v4 = vpop.eup %820  ;;  %v361_v30 = vadd.f32 1.0, %v819_v61 }
 0x22c   :  { %v823_v8 = vpop.eup %822  ;;  %824 = vrcp.f32 %v363_v3  ;;  %v364_v9 = vadd.f32 1.0, %v821_v4  ;;  %v701_v4 = vld [vmem:[%s1178_s8] ss:$0 sm:$0xff]  ;;  %s873_s8 = smov [#allocation2]  }
 0x22d   :  { %826 = vrcp.f32 %v361_v30  ;;  %v362_v39 = vadd.f32 1.0, %v823_v8  ;;  %s659_s21 = sshll.u32 %s873_s8, 4  ;;  %s660_s21 = int_to_ptr.vmem [resolvable:$true] %s659_s21 }
 0x22e   :  { %828 = vrcp.f32 %v364_v9  ;;  %s848_s1 = scalar_lea.vmem %s660_s21, 1024  ;;  %p853_p1 = scmp.lt.s32.totalorder %s660_s21, %s660_s21 }
 0x22f   :  { %830 = vrcp.f32 %v362_v39  ;;  %p849_p0 = scmp.ne.s32.totalorder %s660_s21, %s848_s1  ;;  %p854_p2 = scmp.lt.s32.totalorder %s848_s1, %s848_s1 }
 0x231   :  { %p855_p3 = por %p854_p2, %p853_p1 }
 0x233   :  { %p856_p4 = pnand %p855_p3, %p849_p0 }
 0x236   :  { %v825_v10 = vpop.eup %824 }
 0x237   :  { %v827_v11 = vpop.eup %826  ;;  %v387_v17 = vmul.f32 %v825_v10, %v315_v1 }
 0x238   :  { %v829_v15 = vpop.eup %828  ;;  %v385_v18 = vmul.f32 %v827_v11, %v307_v29 }
 0x239   :  { %v831_v16 = vpop.eup %830  ;;  %v388_v40 = vmul.f32 %v829_v15, %v318_v57 }
 0x23a   :  { %v386_v20 = vmul.f32 %v831_v16, %v310_v59 }
 0x23b   :  { %v394_v23 = vpack.c.bf16 %v388_v40, %v387_v17 }
 0x23c   :  { %v393_v24 = vpack.c.bf16 %v386_v20, %v385_v18 }
 0x23e   :  { %766 = vmatprep.mubr.bf16.mxu1 %v393_v24 }
 0x23f   :  { %767 = vmatmul.mubr.bf16.vlgmr.msra.gmra.mrb[0].mxu1 %v394_v23 }
 0x267   :  { %v736_v25 = vpop.f32.mrb[4].mxu0 }
 0x268   :  { %v331_v26 = vadd.f32 %v736_v25, %v672_v54  ;;  %v322_v27 = vpop.f32.mrb[5].mxu0 }
 0x269   :  { %v323_v28 = vadd.f32 %v672_v54, %v322_v27  ;;  %v737_v31 = vpop.f32.mrb[6].mxu0 }
 0x26a   :  { %v685_v32 = vmul.f32 -1.442695, %v331_v26  ;;  %v334_v33 = vadd.f32 %v737_v31, %v672_v54  ;;  %v325_v36 = vpop.f32.mrb[7].mxu0 }
 0x26b   :  { %v683_v38 = vmul.f32 -1.442695, %v323_v28  ;;  %v326_v41 = vadd.f32 %v672_v54, %v325_v36 }
 0x26c   :  { %832 = vpow2.f32 %v685_v32  ;;  %v686_v43 = vmul.f32 -1.442695, %v334_v33 }
 0x26d   :  { %834 = vpow2.f32 %v683_v38  ;;  %v684_v44 = vmul.f32 -1.442695, %v326_v41 }
 0x26e   :  { %836 = vpow2.f32 %v686_v43 }
 0x26f   :  { %838 = vpow2.f32 %v684_v44  ;;  %v744_v6 = vpop.f32.mrb[8].mxu0 }
 0x270   :  { %v479_v7 = vpop.f32.mrb[9].mxu0 }
 0x271   :  { %v745_v57 = vpop.f32.mrb[10].mxu0 }
 0x272   :  { %v482_v58 = vpop.f32.mrb[11].mxu0 }
 0x276   :  { %v833_v47 = vpop.eup %832 }
 0x277   :  { %v835_v63 = vpop.eup %834  ;;  %v367_v0 = vadd.f32 1.0, %v833_v47  ;;  %v748_v22 = vpop.f32.mrb[12].mxu0 }
 0x278   :  { %v837_v2 = vpop.eup %836  ;;  %v365_v34 = vadd.f32 1.0, %v835_v63  ;;  %v495_v59 = vpop.f32.mrb[13].mxu0 }
 0x279   :  { %v839_v42 = vpop.eup %838  ;;  %840 = vrcp.f32 %v367_v0  ;;  %v368_v46 = vadd.f32 1.0, %v837_v2  ;;  %v749_v60 = vpop.f32.mrb[14].mxu0 }
 0x27a   :  { %842 = vrcp.f32 %v365_v34  ;;  %v366_v48 = vadd.f32 1.0, %v839_v42  ;;  %v498_v12 = vpop.f32.mrb[15].mxu0 }
 0x27b   :  { %844 = vrcp.f32 %v368_v46 }
 0x27c   :  { %846 = vrcp.f32 %v366_v48 }
 0x283   :  { %v841_v49 = vpop.eup %840 }
 0x284   :  { %v843_v50 = vpop.eup %842  ;;  %v391_v53 = vmul.f32 %v841_v49, %v331_v26 }
 0x285   :  { %v845_v51 = vpop.eup %844  ;;  %v389_v56 = vmul.f32 %v843_v50, %v323_v28 }
 0x286   :  { %v847_v52 = vpop.eup %846  ;;  %v392_v54 = vmul.f32 %v845_v51, %v334_v33 }
 0x287   :  { %v390_v1 = vmul.f32 %v847_v52, %v326_v41 }
 0x288   :  { %v396_v5 = vpack.c.bf16 %v392_v54, %v391_v53 }
 0x289   :  { %v395_v29 = vpack.c.bf16 %v390_v1, %v389_v56 }
 0x28b   :  { %770 = vmatprep.mubr.bf16.mxu1 %v395_v29 }
 0x28c   :  { %771 = vmatmul.mubr.bf16.gmra.mrb[4].mxu1 %v396_v5 }
 0x312   :  { %v768_v13 = vpop.f32.mrb[0].mxu1 }
 0x313   :  { %v601_v61 = vadd.f32 %v768_v13, %v744_v6  ;;  %v592_v3 = vpop.f32.mrb[1].mxu1 }
 0x314   :  { %v593_v30 = vadd.f32 %v592_v3, %v479_v7  ;;  %v769_v8 = vpop.f32.mrb[2].mxu1 }
 0x315   :  { %v625_v9 = vmul.f32 %v601_v61, %v1070_v45  ;;  %v604_v39 = vadd.f32 %v769_v8, %v745_v57  ;;  %v595_v10 = vpop.f32.mrb[3].mxu1 }
 0x316   :  { %v623_v11 = vmul.f32 %v593_v30, %v1073_v21  ;;  %v596_v15 = vadd.f32 %v595_v10, %v482_v58 }
 0x317   :  { %v640_v16 = vadd.f32 %v701_v4, %v625_v9  ;;  %v626_v17 = vmul.f32 %v604_v39, %v1076_v55 }
 0x318   :  { %v638_v40 = vadd.f32 %v701_v4, %v623_v11  ;;  %v624_v18 = vmul.f32 %v596_v15, %v1063_v35 }
 0x319   :  { %648 = vst [vmem:[#allocation2 + $0x10] sm:$0xff] %v640_v16  ;;  %v641_v20 = vadd.f32 %v701_v4, %v626_v17 }
 0x31a   :  { %646 = vst [vmem:[#allocation2] sm:$0xff] %v638_v40  ;;  %v639_v23 = vadd.f32 %v701_v4, %v624_v18 }
 0x31b   :  { %649 = vst [vmem:[#allocation2 + $0x18] sm:$0xff] %v641_v20 }
 0x31c   :  { %647 = vst [vmem:[#allocation2 + $0x8] sm:$0xff] %v639_v23 }
 0x35f   :  { %v772_v24 = vpop.f32.mrb[4].mxu1 }
 0x360   :  { %v617_v25 = vadd.f32 %v772_v24, %v748_v22  ;;  %v608_v45 = vpop.f32.mrb[5].mxu1 }
 0x361   :  { %v609_v26 = vadd.f32 %v608_v45, %v495_v59  ;;  %v773_v27 = vpop.f32.mrb[6].mxu1 }
 0x362   :  { %v629_v21 = vmul.f32 %v617_v25, %v1093_v19  ;;  %v620_v28 = vadd.f32 %v773_v27, %v749_v60  ;;  %v611_v31 = vpop.f32.mrb[7].mxu1 }
 0x363   :  { %v627_v55 = vmul.f32 %v609_v26, %v1081_v62  ;;  %v612_v32 = vadd.f32 %v611_v31, %v498_v12 }
 0x364   :  { %v644_v33 = vadd.f32 %v701_v4, %v629_v21  ;;  %v630_v35 = vmul.f32 %v620_v28, %v1097_v37 }
 0x365   :  { %v642_v36 = vadd.f32 %v701_v4, %v627_v55  ;;  %v628_v38 = vmul.f32 %v612_v32, %v1087_v14 }
 0x366   :  { %652 = vst [vmem:[#allocation2 + $0x30] sm:$0xff] %v644_v33  ;;  %v645_v41 = vadd.f32 %v701_v4, %v630_v35 }
 0x367   :  { %650 = vst [vmem:[#allocation2 + $0x20] sm:$0xff] %v642_v36  ;;  %v643_v43 = vadd.f32 %v701_v4, %v628_v38 }
 0x368   :  { %653 = vst [vmem:[#allocation2 + $0x38] sm:$0xff] %v645_v41 }
 0x369   :  { %651 = vst [vmem:[#allocation2 + $0x28] sm:$0xff] %v643_v43 }
 0x36a   :  { %859 = shalt.err (!%p856_p4)
}
 0x36b   :  { %s860_s24 = scalar_lea.hbm %s1179_s9, 1024 }
 0x36c   :  { %p861_p5 = scmp.ne.s32.totalorder %s1179_s9, %s860_s24  ;;  %p864_p6 = scmp.lt.u32.totalorder %s860_s24, %s1179_s9 }
 0x36e   :  { %p866_p7 = pnand %p864_p6, %p861_p5 }
 0x370   :  { %869 = shalt.err (!%p866_p7)
}
 0x371   :  { %s874_s26 = smov 128   ;;  %s875_s27 = smov 8  }
 0x372   :  { %665 = dma.vmem_to_hbm [thread:$0]  %s660_s21, 1024, %s1179_s9, [#allocation3], %s874_s26, %s874_s26, %s875_s27  }
 0x373   :  { %870 = dma.done.wait [#allocation3], 1024  }
 0x374   :  { %871 = vsyncadd [#allocation3], 4294966272 }
 0x375   :  { %669 = vsyncpa [#allocation3], 1 }

// kernel: tpu_custom_call.1
= control target key start
LH: loop header
LB: loop body
LE: loop exit
PB: predicated region body
PF: predicated region fallthrough
CT: control target
= control target key end

     0   :  { %vm50_vm0 = vcmask 261120   ;;  %s1170_s0 = inlined_call_operand.vmem [shape: f32[64,32], index: 0, kind: input, shape index: {}]   ;;  %s1171_s1 = inlined_call_operand.vmem [shape: f32[64,1], index: 1, kind: input, shape index: {}]   ;;  %s1172_s2 = inlined_call_operand.vmem [shape: f32[1,32], index: 2, kind: input, shape index: {}]   ;;  %s1173_s3 = inlined_call_operand.vmem [shape: f32[1,32], index: 3, kind: input, shape index: {}]   ;;  %s1174_s4 = inlined_call_operand.vmem [shape: bf16[32,128], index: 4, kind: input, shape index: {}]   ;;  %s1175_s5 = inlined_call_operand.vmem [shape: f32[1,128], index: 5, kind: input, shape index: {}]   ;;  %s1176_s6 = inlined_call_operand.vmem [shape: bf16[128,128], index: 6, kind: input, shape index: {}]   ;;  %s1177_s7 = inlined_call_operand.vmem [shape: bf16[32,128], index: 7, kind: input, shape index: {}]   ;;  %s1178_s8 = inlined_call_operand.vmem [shape: f32[1,128], index: 8, kind: input, shape index: {}]   ;;  %s1179_s9 = inlined_call_operand.hbm [shape: f32[64,128], index: 9, kind: output, shape index: {}]  }
   0x1   :  { %v929_v0 = vld [vmem:[%s1170_s0] sm:$0xff]  ;;  %v934_v1 = vld [vmem:[%s1170_s0 + $0x10] sm:$0xff]  ;;  %v939_v2 = vld [vmem:[%s1170_s0 + $0x8] sm:$0xff] }
   0x2   :  { %v51_v3 = vsel %vm50_vm0, %v929_v0, 0.0  ;;  %v57_v4 = vsel %vm50_vm0, %v934_v1, 0.0  ;;  %v948_v5 = vld [vmem:[%s1170_s0 + $0x18] sm:$0xff]  ;;  %v953_v6 = vld [vmem:[%s1170_s0 + $0x20] sm:$0xff]  ;;  %v958_v7 = vld [vmem:[%s1170_s0 + $0x28] sm:$0xff]  ;;  %v54_v8 = vsel %vm50_vm0, %v939_v2, 0.0 }
   0x3   :  { %52 = vadd.xlane.f32.xlu0 %v51_v3  ;;  %58 = vadd.xlane.f32.xlu1 %v57_v4  ;;  %v60_v9 = vsel %vm50_vm0, %v948_v5, 0.0  ;;  %v63_v10 = vsel %vm50_vm0, %v953_v6, 0.0  ;;  %v66_v11 = vsel %vm50_vm0, %v958_v7, 0.0  ;;  %v971_v12 = vld [vmem:[%s1170_s0 + $0x30] sm:$0xff]  ;;  %v976_v13 = vld [vmem:[%s1170_s0 + $0x38] sm:$0xff] }
   0x4   :  { %v69_v14 = vsel %vm50_vm0, %v971_v12, 0.0  ;;  %v72_v15 = vsel %vm50_vm0, %v976_v13, 0.0 }
   0x7   :  { %55 = vadd.xlane.f32.xlu0 %v54_v8  ;;  %61 = vadd.xlane.f32.xlu1 %v60_v9 }
   0xb   :  { %64 = vadd.xlane.f32.xlu0 %v63_v10  ;;  %67 = vadd.xlane.f32.xlu1 %v66_v11 }
   0xc   :  { %14 = vsyncpa [#allocation3], 0  ;;  %v872_v16 = vmov 0   ;;  %v43_v52 = vld [vmem:[%s1171_s1 + $0x8] sm:$0xff]  ;;  %v44_v53 = vld [vmem:[%s1171_s1 + $0x10] sm:$0xff] }
   0xd   :  { %787 = vset.pattern.permute.xlu1 %v872_v16  ;;  %786 = vset.pattern.permute.xlu0 %v872_v16  ;;  %v42_v54 = vld [vmem:[%s1171_s1] sm:$0xff]  ;;  %v45_v55 = vld [vmem:[%s1171_s1 + $0x18] sm:$0xff]  ;;  %v47_v58 = vld [vmem:[%s1171_s1 + $0x28] sm:$0xff] }
   0xe   :  { %v46_v56 = vld [vmem:[%s1171_s1 + $0x20] sm:$0xff]  ;;  %v789_v59 = vld [vmem:[%s1174_s4 + $0x8] sm:$0xff]   ;;  %v48_v60 = vld [vmem:[%s1171_s1 + $0x30] sm:$0xff] }
   0xf   :  { %70 = vadd.xlane.f32.xlu0 %v69_v14  ;;  %73 = vadd.xlane.f32.xlu1 %v72_v15  ;;  %v788_v57 = vld [vmem:[%s1174_s4] sm:$0xff]   ;;  %v49_v8 = vld [vmem:[%s1171_s1 + $0x38] sm:$0xff] }
  0x10   :  { %726 = vmatprep.subr.bf16.mxu0 %v788_v57 }
  0x11   :  { %727 = vmatpush3.bf16.msra.mxu0 %v788_v57 }
  0x12   :  { %728 = vmatprep.subr.bf16.mxu0 %v789_v59 }
  0x15   :  { %729 = vmatpush3.bf16.msra.mxu0 %v789_v59 }
  0x90   :  { %v53_v17 = vpop.xlane.xlu0 %52  ;;  %v59_v18 = vpop.xlane.xlu1 %58 }
  0x91   :  { %v75_v19 = vmul.f32 0.03125, %v53_v17  ;;  %v77_v20 = vmul.f32 0.03125, %v59_v18 }
  0x93   :  { %v983_v21 = vsub.f32 %v929_v0, %v75_v19  ;;  %v986_v22 = vsub.f32 %v934_v1, %v77_v20 }
  0x94   :  { %v56_v23 = vpop.xlane.xlu0 %55  ;;  %v62_v24 = vpop.xlane.xlu1 %61 }
  0x95   :  { %v76_v25 = vmul.f32 0.03125, %v56_v23  ;;  %v78_v26 = vmul.f32 0.03125, %v62_v24  ;;  %v91_v27 = vmul.f32 %v983_v21, %v983_v21  ;;  %v93_v28 = vmul.f32 %v986_v22, %v986_v22 }
  0x97   :  { %v993_v29 = vsub.f32 %v939_v2, %v76_v25  ;;  %v996_v30 = vsub.f32 %v948_v5, %v78_v26  ;;  %v99_v31 = vsel %vm50_vm0, %v91_v27, 0.0  ;;  %v105_v34 = vsel %vm50_vm0, %v93_v28, 0.0 }
  0x98   :  { %100 = vadd.xlane.f32.xlu0 %v99_v31  ;;  %v65_v32 = vpop.xlane.xlu0 %64  ;;  %v68_v33 = vpop.xlane.xlu1 %67 }
  0x99   :  { %v79_v35 = vmul.f32 0.03125, %v65_v32  ;;  %v80_v36 = vmul.f32 0.03125, %v68_v33  ;;  %v92_v37 = vmul.f32 %v993_v29, %v993_v29  ;;  %v94_v38 = vmul.f32 %v996_v30, %v996_v30 }
  0x9b   :  { %v1005_v39 = vsub.f32 %v953_v6, %v79_v35  ;;  %v1008_v40 = vsub.f32 %v958_v7, %v80_v36  ;;  %v102_v41 = vsel %vm50_vm0, %v92_v37, 0.0  ;;  %v108_v44 = vsel %vm50_vm0, %v94_v38, 0.0 }
  0x9c   :  { %106 = vadd.xlane.f32.xlu0 %v105_v34  ;;  %103 = vadd.xlane.f32.xlu1 %v102_v41  ;;  %v71_v42 = vpop.xlane.xlu0 %70  ;;  %v74_v61 = vpop.xlane.xlu1 %73  ;;  %v670_v34 = vld [vmem:[%s1172_s2] ss:$0 sm:$0xff] }
  0x9d   :  { %v81_v43 = vmul.f32 0.03125, %v71_v42  ;;  %v95_v45 = vmul.f32 %v1005_v39, %v1005_v39  ;;  %v96_v46 = vmul.f32 %v1008_v40, %v1008_v40  ;;  %v82_v62 = vmul.f32 0.03125, %v74_v61  ;;  %v671_v42 = vld [vmem:[%s1173_s3] ss:$0 sm:$0xff] }
  0x9f   :  { %v1017_v47 = vsub.f32 %v971_v12, %v81_v43  ;;  %v111_v48 = vsel %vm50_vm0, %v95_v45, 0.0  ;;  %v114_v49 = vsel %vm50_vm0, %v96_v46, 0.0  ;;  %v1052_v63 = vsub.f32 %v976_v13, %v82_v62 }
  0xa0   :  { %109 = vadd.xlane.f32.xlu1 %v108_v44  ;;  %112 = vadd.xlane.f32.xlu0 %v111_v48 }
  0xa1   :  { %v97_v50 = vmul.f32 %v1017_v47, %v1017_v47  ;;  %v98_v3 = vmul.f32 %v1052_v63, %v1052_v63 }
  0xa3   :  { %v117_v51 = vsel %vm50_vm0, %v97_v50, 0.0  ;;  %v120_v4 = vsel %vm50_vm0, %v98_v3, 0.0 }
  0xa4   :  { %115 = vadd.xlane.f32.xlu1 %v114_v49  ;;  %118 = vadd.xlane.f32.xlu0 %v117_v51 }
  0xb5   :  { %192 = vperm.xlu1 %787, %v43_v52  }
  0xb9   :  { %197 = vperm.xlu1 %787, %v44_v53  }
  0xba   :  { %187 = vperm.xlu0 %786, %v42_v54  }
  0xbd   :  { %202 = vperm.xlu1 %787, %v45_v55  }
  0xc1   :  { %207 = vperm.xlu1 %787, %v46_v56  }
  0xc5   :  { %212 = vperm.xlu1 %787, %v47_v58  }
  0xc9   :  { %217 = vperm.xlu1 %787, %v48_v60  }
  0xed   :  { %121 = vadd.xlane.f32.xlu1 %v120_v4 }
  0xfe   :  { %222 = vperm.xlu1 %787, %v49_v8  }
 0x125   :  { %v101_v9 = vpop.xlane.xlu0 %100 }
 0x126   :  { %v123_v10 = vmul.f32 0.03125, %v101_v9 }
 0x128   :  { %v131_v11 = vadd.f32 1e-05, %v123_v10 }
 0x129   :  { %v104_v14 = vpop.xlane.xlu1 %103  ;;  %v107_v15 = vpop.xlane.xlu0 %106 }
 0x12a   :  { %800 = vrsqrt.f32 %v131_v11  ;;  %v124_v16 = vmul.f32 0.03125, %v104_v14  ;;  %v125_v17 = vmul.f32 0.03125, %v107_v15 }
 0x12c   :  { %v132_v18 = vadd.f32 1e-05, %v124_v16  ;;  %v133_v19 = vadd.f32 1e-05, %v125_v17 }
 0x12d   :  { %v110_v20 = vpop.xlane.xlu1 %109  ;;  %v113_v23 = vpop.xlane.xlu0 %112 }
 0x12e   :  { %802 = vrsqrt.f32 %v132_v18  ;;  %v126_v24 = vmul.f32 0.03125, %v110_v20  ;;  %v127_v25 = vmul.f32 0.03125, %v113_v23 }
 0x12f   :  { %804 = vrsqrt.f32 %v133_v19 }
 0x130   :  { %v134_v26 = vadd.f32 1e-05, %v126_v24  ;;  %v135_v27 = vadd.f32 1e-05, %v127_v25 }
 0x131   :  { %v116_v28 = vpop.xlane.xlu1 %115  ;;  %v119_v41 = vpop.xlane.xlu0 %118 }
 0x132   :  { %806 = vrsqrt.f32 %v134_v26  ;;  %v128_v31 = vmul.f32 0.03125, %v116_v28 }
 0x133   :  { %808 = vrsqrt.f32 %v135_v27 }
 0x134   :  { %v801_v32 = vpop.eup %800  ;;  %v136_v33 = vadd.f32 1e-05, %v128_v31 }
 0x135   :  { %v1063_v35 = vpop.permute.xlu1 %192  ;;  %v147_v36 = vmul.f32 %v801_v32, %v983_v21 }
 0x136   :  { %810 = vrsqrt.f32 %v136_v33 }
 0x137   :  { %v162_v37 = vmul.f32 %v670_v34, %v147_v36 }
 0x138   :  { %v803_v38 = vpop.eup %802 }
 0x139   :  { %v805_v43 = vpop.eup %804  ;;  %v148_v44 = vmul.f32 %v803_v38, %v993_v29  ;;  %v1070_v45 = vpop.permute.xlu1 %197  ;;  %v177_v49 = vadd.f32 %v671_v42, %v162_v37 }
 0x13a   :  { %v149_v46 = vmul.f32 %v805_v43, %v986_v22  ;;  %v1073_v21 = vpop.permute.xlu0 %187  ;;  %v413_v43 = vpack.c.bf16 %v939_v2, %v929_v0  ;;  %v792_v0 = vld [vmem:[%s1176_s6 + $0x10] sm:$0xff]   ;;  %v793_v2 = vld [vmem:[%s1176_s6 + $0x18] sm:$0xff]  }
 0x13b   :  { %v163_v48 = vmul.f32 %v670_v34, %v148_v44  ;;  %v225_v58 = vmul.f32 %v1073_v21, %v177_v49  ;;  %v798_v49 = vld [vmem:[%s1177_s7 + $0x8] sm:$0xff]  }
 0x13c   :  { %v807_v50 = vpop.eup %806  ;;  %v164_v51 = vmul.f32 %v670_v34, %v149_v46  ;;  %v796_v46 = vld [vmem:[%s1177_s7] sm:$0xff]  }
 0x13d   :  { %v809_v52 = vpop.eup %808  ;;  %v178_v53 = vadd.f32 %v671_v42, %v163_v48  ;;  %v150_v54 = vmul.f32 %v807_v50, %v996_v30  ;;  %v1076_v55 = vpop.permute.xlu1 %202  ;;  %v797_v48 = vld [vmem:[%s1176_s6 + $0x30] sm:$0xff]   ;;  %738 = vmatprep.subr.bf16.mxu0 %v796_v46  ;;  %v799_v50 = vld [vmem:[%s1176_s6 + $0x38] sm:$0xff]  }
 0x13e   :  { %v151_v56 = vmul.f32 %v809_v52, %v1005_v39  ;;  %v179_v57 = vadd.f32 %v671_v42, %v164_v51  ;;  %v414_v51 = vpack.c.bf16 %v948_v5, %v934_v1  ;;  %v415_v52 = vpack.c.bf16 %v958_v7, %v953_v6 }
 0x13f   :  { %v226_v29 = vmul.f32 %v1063_v35, %v178_v53  ;;  %v165_v22 = vmul.f32 %v670_v34, %v150_v54  ;;  %v416_v53 = vpack.c.bf16 %v976_v13, %v971_v12  ;;  %v672_v54 = vld [vmem:[%s1175_s5] ss:$0 sm:$0xff] }
 0x140   :  { %v811_v59 = vpop.eup %810  ;;  %v166_v60 = vmul.f32 %v670_v34, %v151_v56  ;;  %v227_v30 = vmul.f32 %v1070_v45, %v179_v57 }
 0x141   :  { %v180_v61 = vadd.f32 %v671_v42, %v165_v22  ;;  %v1081_v62 = vpop.permute.xlu1 %207  ;;  %v233_v3 = vpack.c.bf16 %v226_v29, %v225_v58  ;;  %v152_v4 = vmul.f32 %v811_v59, %v1008_v40  ;;  %v129_v40 = vmul.f32 0.03125, %v119_v41 }
 0x142   :  { %v181_v9 = vadd.f32 %v671_v42, %v166_v60 }
 0x143   :  { %v228_v8 = vmul.f32 %v1076_v55, %v180_v61  ;;  %730 = vmatprep.mubr.msk.bf16.mxu0 %vm50_vm0, %v233_v3  ;;  %v167_v39 = vmul.f32 %v670_v34, %v152_v4  ;;  %v137_v18 = vadd.f32 1e-05, %v129_v40 }
 0x144   :  { %v229_v15 = vmul.f32 %v1081_v62, %v181_v9 }
 0x145   :  { %v234_v10 = vpack.c.bf16 %v228_v8, %v227_v30  ;;  %v182_v11 = vadd.f32 %v671_v42, %v167_v39  ;;  %v1087_v14 = vpop.permute.xlu1 %212  ;;  %812 = vrsqrt.f32 %v137_v18 }
 0x147   :  { %v230_v16 = vmul.f32 %v1087_v14, %v182_v11  ;;  %731 = vmatmul.mubr.msk.bf16.vlgmr.msra.gmra.mrb[0].mxu0 %vm50_vm0, %v234_v10 }
 0x148   :  { %739 = vmatpush3.bf16.msra.mxu0 %v796_v46 }
 0x149   :  { %v235_v17 = vpack.c.bf16 %v230_v16, %v229_v15  ;;  %v1093_v19 = vpop.permute.xlu1 %217  ;;  %740 = vmatprep.subr.bf16.mxu0 %v798_v49 }
 0x14b   :  { %734 = vmatprep.mubr.msk.bf16.mxu0 %vm50_vm0, %v235_v17 }
 0x14c   :  { %741 = vmatpush3.bf16.msra.mxu0 %v798_v49 }
 0x14f   :  { %v813_v25 = vpop.eup %812 }
 0x150   :  { %v153_v26 = vmul.f32 %v813_v25, %v1017_v47  ;;  %v790_v47 = vld [vmem:[%s1176_s6] sm:$0xff]  }
 0x151   :  { %750 = vmatprep.subr.bf16.mxu1 %v790_v47 }
 0x152   :  { %v168_v28 = vmul.f32 %v670_v34, %v153_v26  ;;  %751 = vmatpush3.bf16.msra.mxu1 %v790_v47 }
 0x154   :  { %v183_v33 = vadd.f32 %v671_v42, %v168_v28 }
 0x156   :  { %v231_v38 = vmul.f32 %v1093_v19, %v183_v33 }
 0x17a   :  { %v122_v20 = vpop.xlane.xlu1 %121 }
 0x17b   :  { %v130_v23 = vmul.f32 0.03125, %v122_v20 }
 0x17d   :  { %v138_v24 = vadd.f32 1e-05, %v130_v23 }
 0x17e   :  { %v1097_v37 = vpop.permute.xlu1 %222 }
 0x17f   :  { %814 = vrsqrt.f32 %v138_v24 }
 0x189   :  { %v815_v27 = vpop.eup %814 }
 0x18a   :  { %v154_v31 = vmul.f32 %v815_v27, %v1052_v63  ;;  %v791_v63 = vld [vmem:[%s1176_s6 + $0x8] sm:$0xff]  }
 0x18b   :  { %752 = vmatprep.subr.bf16.mxu1 %v791_v63 }
 0x18c   :  { %v169_v32 = vmul.f32 %v670_v34, %v154_v31  ;;  %753 = vmatpush3.bf16.msra.mxu1 %v791_v63  ;;  %v794_v34 = vld [vmem:[%s1176_s6 + $0x20] sm:$0xff]  }
 0x18d   :  { %754 = vmatprep.subr.bf16.mxu1 %v792_v0 }
 0x18e   :  { %v184_v36 = vadd.f32 %v671_v42, %v169_v32  ;;  %v795_v42 = vld [vmem:[%s1176_s6 + $0x28] sm:$0xff]  }
 0x190   :  { %v232_v41 = vmul.f32 %v1097_v37, %v184_v36  ;;  %755 = vmatpush3.bf16.msra.mxu1 %v792_v0 }
 0x191   :  { %756 = vmatprep.subr.bf16.mxu1 %v793_v2 }
 0x192   :  { %v236_v44 = vpack.c.bf16 %v232_v41, %v231_v38 }
 0x194   :  { %735 = vmatmul.mubr.msk.bf16.gmra.mrb[4].mxu0 %vm50_vm0, %v236_v44  ;;  %757 = vmatpush3.bf16.msra.mxu1 %v793_v2 }
 0x195   :  { %742 = vmatprep.mubr.msk.bf16.mxu0 %vm50_vm0, %v413_v43  ;;  %758 = vmatprep.subr.bf16.mxu1 %v794_v34 }
 0x198   :  { %759 = vmatpush3.bf16.msra.mxu1 %v794_v34 }
 0x199   :  { %760 = vmatprep.subr.bf16.mxu1 %v795_v42 }
 0x19c   :  { %761 = vmatpush3.bf16.msra.mxu1 %v795_v42  ;;  %743 = vmatmul.mubr.msk.bf16.vlgmr.msra.gmra.mrb[8].mxu0 %vm50_vm0, %v414_v51 }
 0x19d   :  { %762 = vmatprep.subr.bf16.mxu1 %v797_v48  ;;  %746 = vmatprep.mubr.msk.bf16.mxu0 %vm50_vm0, %v415_v52 }
 0x1a0   :  { %763 = vmatpush3.bf16.msra.mxu1 %v797_v48 }
 0x1a1   :  { %764 = vmatprep.subr.bf16.mxu1 %v799_v50 }
 0x1a4   :  { %765 = vmatpush3.bf16.msra.mxu1 %v799_v50  ;;  %747 = vmatmul.mubr.msk.bf16.gmra.mrb[12].mxu0 %vm50_vm0, %v416_v53 }
 0x21a   :  { %v732_v56 = vpop.f32.mrb[0].mxu0 }
 0x21b   :  { %v315_v1 = vadd.f32 %v732_v56, %v672_v54  ;;  %v306_v5 = vpop.f32.mrb[1].mxu0 }
 0x21c   :  { %v307_v29 = vadd.f32 %v672_v54, %v306_v5  ;;  %v733_v6 = vpop.f32.mrb[2].mxu0 }
 0x21d   :  { %v681_v7 = vmul.f32 -1.442695, %v315_v1  ;;  %v318_v57 = vadd.f32 %v733_v6, %v672_v54  ;;  %v309_v58 = vpop.f32.mrb[3].mxu0 }
 0x21e   :  { %v679_v22 = vmul.f32 -1.442695, %v307_v29  ;;  %v310_v59 = vadd.f32 %v672_v54, %v309_v58 }
 0x21f   :  { %816 = vpow2.f32 %v681_v7  ;;  %v682_v60 = vmul.f32 -1.442695, %v318_v57 }
 0x220   :  { %818 = vpow2.f32 %v679_v22  ;;  %v680_v12 = vmul.f32 -1.442695, %v310_v59 }
 0x221   :  { %820 = vpow2.f32 %v682_v60 }
 0x222   :  { %822 = vpow2.f32 %v680_v12 }
 0x229   :  { %v817_v13 = vpop.eup %816 }
 0x22a   :  { %v819_v61 = vpop.eup %818  ;;  %v363_v3 = vadd.f32 1.0, %v817_v13 }
 0x22b   :  { %v821_v4 = vpop.eup %820  ;;  %v361_v30 = vadd.f32 1.0, %v819_v61 }
 0x22c   :  { %v823_v8 = vpop.eup %822  ;;  %824 = vrcp.f32 %v363_v3  ;;  %v364_v9 = vadd.f32 1.0, %v821_v4  ;;  %v701_v4 = vld [vmem:[%s1178_s8] ss:$0 sm:$0xff]  ;;  %s873_s8 = smov [#allocation2]  }
 0x22d   :  { %826 = vrcp.f32 %v361_v30  ;;  %v362_v39 = vadd.f32 1.0, %v823_v8  ;;  %s659_s21 = sshll.u32 %s873_s8, 4  ;;  %s660_s21 = int_to_ptr.vmem [resolvable:$true] %s659_s21 }
 0x22e   :  { %828 = vrcp.f32 %v364_v9  ;;  %s848_s1 = scalar_lea.vmem %s660_s21, 1024  ;;  %p853_p1 = scmp.lt.s32.totalorder %s660_s21, %s660_s21 }
 0x22f   :  { %830 = vrcp.f32 %v362_v39  ;;  %p849_p0 = scmp.ne.s32.totalorder %s660_s21, %s848_s1  ;;  %p854_p2 = scmp.lt.s32.totalorder %s848_s1, %s848_s1 }
 0x231   :  { %p855_p3 = por %p854_p2, %p853_p1 }
 0x233   :  { %p856_p4 = pnand %p855_p3, %p849_p0 }
 0x236   :  { %v825_v10 = vpop.eup %824 }
 0x237   :  { %v827_v11 = vpop.eup %826  ;;  %v387_v17 = vmul.f32 %v825_v10, %v315_v1 }
 0x238   :  { %v829_v15 = vpop.eup %828  ;;  %v385_v18 = vmul.f32 %v827_v11, %v307_v29 }
 0x239   :  { %v831_v16 = vpop.eup %830  ;;  %v388_v40 = vmul.f32 %v829_v15, %v318_v57 }
 0x23a   :  { %v386_v20 = vmul.f32 %v831_v16, %v310_v59 }
 0x23b   :  { %v394_v23 = vpack.c.bf16 %v388_v40, %v387_v17 }
 0x23c   :  { %v393_v24 = vpack.c.bf16 %v386_v20, %v385_v18 }
 0x23e   :  { %766 = vmatprep.mubr.bf16.mxu1 %v393_v24 }
 0x23f   :  { %767 = vmatmul.mubr.bf16.vlgmr.msra.gmra.mrb[0].mxu1 %v394_v23 }
 0x267   :  { %v736_v25 = vpop.f32.mrb[4].mxu0 }
 0x268   :  { %v331_v26 = vadd.f32 %v736_v25, %v672_v54  ;;  %v322_v27 = vpop.f32.mrb[5].mxu0 }
 0x269   :  { %v323_v28 = vadd.f32 %v672_v54, %v322_v27  ;;  %v737_v31 = vpop.f32.mrb[6].mxu0 }
 0x26a   :  { %v685_v32 = vmul.f32 -1.442695, %v331_v26  ;;  %v334_v33 = vadd.f32 %v737_v31, %v672_v54  ;;  %v325_v36 = vpop.f32.mrb[7].mxu0 }
 0x26b   :  { %v683_v38 = vmul.f32 -1.442695, %v323_v28  ;;  %v326_v41 = vadd.f32 %v672_v54, %v325_v36 }
 0x26c   :  { %832 = vpow2.f32 %v685_v32  ;;  %v686_v43 = vmul.f32 -1.442695, %v334_v33 }
 0x26d   :  { %834 = vpow2.f32 %v683_v38  ;;  %v684_v44 = vmul.f32 -1.442695, %v326_v41 }
 0x26e   :  { %836 = vpow2.f32 %v686_v43 }
 0x26f   :  { %838 = vpow2.f32 %v684_v44  ;;  %v744_v6 = vpop.f32.mrb[8].mxu0 }
 0x270   :  { %v479_v7 = vpop.f32.mrb[9].mxu0 }
 0x271   :  { %v745_v57 = vpop.f32.mrb[10].mxu0 }
 0x272   :  { %v482_v58 = vpop.f32.mrb[11].mxu0 }
 0x276   :  { %v833_v47 = vpop.eup %832 }
 0x277   :  { %v835_v63 = vpop.eup %834  ;;  %v367_v0 = vadd.f32 1.0, %v833_v47  ;;  %v748_v22 = vpop.f32.mrb[12].mxu0 }
 0x278   :  { %v837_v2 = vpop.eup %836  ;;  %v365_v34 = vadd.f32 1.0, %v835_v63  ;;  %v495_v59 = vpop.f32.mrb[13].mxu0 }
 0x279   :  { %v839_v42 = vpop.eup %838  ;;  %840 = vrcp.f32 %v367_v0  ;;  %v368_v46 = vadd.f32 1.0, %v837_v2  ;;  %v749_v60 = vpop.f32.mrb[14].mxu0 }
 0x27a   :  { %842 = vrcp.f32 %v365_v34  ;;  %v366_v48 = vadd.f32 1.0, %v839_v42  ;;  %v498_v12 = vpop.f32.mrb[15].mxu0 }
 0x27b   :  { %844 = vrcp.f32 %v368_v46 }
 0x27c   :  { %846 = vrcp.f32 %v366_v48 }
 0x283   :  { %v841_v49 = vpop.eup %840 }
 0x284   :  { %v843_v50 = vpop.eup %842  ;;  %v391_v53 = vmul.f32 %v841_v49, %v331_v26 }
 0x285   :  { %v845_v51 = vpop.eup %844  ;;  %v389_v56 = vmul.f32 %v843_v50, %v323_v28 }
 0x286   :  { %v847_v52 = vpop.eup %846  ;;  %v392_v54 = vmul.f32 %v845_v51, %v334_v33 }
 0x287   :  { %v390_v1 = vmul.f32 %v847_v52, %v326_v41 }
 0x288   :  { %v396_v5 = vpack.c.bf16 %v392_v54, %v391_v53 }
 0x289   :  { %v395_v29 = vpack.c.bf16 %v390_v1, %v389_v56 }
 0x28b   :  { %770 = vmatprep.mubr.bf16.mxu1 %v395_v29 }
 0x28c   :  { %771 = vmatmul.mubr.bf16.gmra.mrb[4].mxu1 %v396_v5 }
 0x312   :  { %v768_v13 = vpop.f32.mrb[0].mxu1 }
 0x313   :  { %v601_v61 = vadd.f32 %v768_v13, %v744_v6  ;;  %v592_v3 = vpop.f32.mrb[1].mxu1 }
 0x314   :  { %v593_v30 = vadd.f32 %v592_v3, %v479_v7  ;;  %v769_v8 = vpop.f32.mrb[2].mxu1 }
 0x315   :  { %v625_v9 = vmul.f32 %v601_v61, %v1070_v45  ;;  %v604_v39 = vadd.f32 %v769_v8, %v745_v57  ;;  %v595_v10 = vpop.f32.mrb[3].mxu1 }
 0x316   :  { %v623_v11 = vmul.f32 %v593_v30, %v1073_v21  ;;  %v596_v15 = vadd.f32 %v595_v10, %v482_v58 }
 0x317   :  { %v640_v16 = vadd.f32 %v701_v4, %v625_v9  ;;  %v626_v17 = vmul.f32 %v604_v39, %v1076_v55 }
 0x318   :  { %v638_v40 = vadd.f32 %v701_v4, %v623_v11  ;;  %v624_v18 = vmul.f32 %v596_v15, %v1063_v35 }
 0x319   :  { %648 = vst [vmem:[#allocation2 + $0x10] sm:$0xff] %v640_v16  ;;  %v641_v20 = vadd.f32 %v701_v4, %v626_v17 }
 0x31a   :  { %646 = vst [vmem:[#allocation2] sm:$0xff] %v638_v40  ;;  %v639_v23 = vadd.f32 %v701_v4, %v624_v18 }
 0x31b   :  { %649 = vst [vmem:[#allocation2 + $0x18] sm:$0xff] %v641_v20 }
 0x31c   :  { %647 = vst [vmem:[#allocation2 + $0x8] sm:$0xff] %v639_v23 }
 0x35f   :  { %v772_v24 = vpop.f32.mrb[4].mxu1 }
 0x360   :  { %v617_v25 = vadd.f32 %v772_v24, %v748_v22  ;;  %v608_v45 = vpop.f32.mrb[5].mxu1 }
 0x361   :  { %v609_v26 = vadd.f32 %v608_v45, %v495_v59  ;;  %v773_v27 = vpop.f32.mrb[6].mxu1 }
 0x362   :  { %v629_v21 = vmul.f32 %v617_v25, %v1093_v19  ;;  %v620_v28 = vadd.f32 %v773_v27, %v749_v60  ;;  %v611_v31 = vpop.f32.mrb[7].mxu1 }
 0x363   :  { %v627_v55 = vmul.f32 %v609_v26, %v1081_v62  ;;  %v612_v32 = vadd.f32 %v611_v31, %v498_v12 }
 0x364   :  { %v644_v33 = vadd.f32 %v701_v4, %v629_v21  ;;  %v630_v35 = vmul.f32 %v620_v28, %v1097_v37 }
 0x365   :  { %v642_v36 = vadd.f32 %v701_v4, %v627_v55  ;;  %v628_v38 = vmul.f32 %v612_v32, %v1087_v14 }
 0x366   :  { %652 = vst [vmem:[#allocation2 + $0x30] sm:$0xff] %v644_v33  ;;  %v645_v41 = vadd.f32 %v701_v4, %v630_v35 }
 0x367   :  { %650 = vst [vmem:[#allocation2 + $0x20] sm:$0xff] %v642_v36  ;;  %v643_v43 = vadd.f32 %v701_v4, %v628_v38 }
 0x368   :  { %653 = vst [vmem:[#allocation2 + $0x38] sm:$0xff] %v645_v41 }
 0x369   :  { %651 = vst [vmem:[#allocation2 + $0x28] sm:$0xff] %v643_v43 }
 0x36a   :  { %859 = shalt.err (!%p856_p4)
}
 0x36b   :  { %s860_s24 = scalar_lea.hbm %s1179_s9, 1024 }
 0x36c   :  { %p861_p5 = scmp.ne.s32.totalorder %s1179_s9, %s860_s24  ;;  %p864_p6 = scmp.lt.u32.totalorder %s860_s24, %s1179_s9 }
 0x36e   :  { %p866_p7 = pnand %p864_p6, %p861_p5 }
 0x370   :  { %869 = shalt.err (!%p866_p7)
}
 0x371   :  { %s874_s26 = smov 128   ;;  %s875_s27 = smov 8  }
 0x372   :  { %665 = dma.vmem_to_hbm [thread:$0]  %s660_s21, 1024, %s1179_s9, [#allocation3], %s874_s26, %s874_s26, %s875_s27  }
 0x373   :  { %870 = dma.done.wait [#allocation3], 1024  }
 0x374   :  { %871 = vsyncadd [#allocation3], 4294966272 }
 0x375   :  { %669 = vsyncpa [#allocation3], 1 }

</bundles_post_ra>
